<compile_context>
chip_gen: v7x
topology: tpu7x:2x2x1
jax: 0.10.0
libtpu: 0.0.40
codegen_flags: <defaults>
</compile_context>

<pallas_src>
import functools

import jax
import jax.numpy as jnp
from jax import lax
from jax.experimental import pallas as pl
from jax.experimental.pallas import tpu as pltpu


def _window_block_kernel(
    x_ref, adj_ref, wqkv_ref, wdd_ref, wfc1_ref, wfc2_ref, bias_ref, o_ref,
    *, group, num_windows, window, num_heads, head_dim, mlp_hidden,
    scale, eps, cross, mm_dtype):
  G, P, Nw, H, hd, M = group, num_windows, window, num_heads, head_dim, mlp_hidden
  D = H * hd
  R = P * Nw
  f32 = jnp.float32

  def mm(a, b):                                     # MXU matmul, f32 accumulation
    return jnp.dot(a.astype(mm_dtype), b.astype(mm_dtype),
                   preferred_element_type=f32)

  def bdot(a, b, dims):                             # batched matmul (batch axis 0)
    return lax.dot_general(a.astype(mm_dtype), b.astype(mm_dtype), dims,
                           preferred_element_type=f32)

  def layer_norm(y):                                # elementwise_affine=False
    mu = jnp.mean(y, axis=-1, keepdims=True)
    var = jnp.mean(jnp.square(y - mu), axis=-1, keepdims=True)
    return (y - mu) * lax.rsqrt(var + eps)

  def erf(z):
    # Abramowitz & Stegun 7.1.26, |err| < 1.5e-7; uses only exp/abs/where (always lowers).
    a1, a2, a3, a4, a5 = 0.254829592, -0.284496736, 1.421413741, -1.453152027, 1.061405429
    sgn = jnp.where(z >= 0.0, 1.0, -1.0)
    az = jnp.abs(z)
    t = 1.0 / (1.0 + 0.3275911 * az)
    poly = ((((a5 * t + a4) * t + a3) * t + a2) * t + a1) * t
    return sgn * (1.0 - poly * jnp.exp(-az * az))

  def gelu(z):                                      # exact (erf-based) GELU = torch.nn.GELU()
    return 0.5 * z * (1.0 + erf(z * 0.7071067811865476))

  def bias(row, width):                             # (1, width) row from the packed bias slab
    return bias_ref[row:row + 1, :width]

  def mlp_branch(y, which):                         # which: 0 = smlp, 1 = nmlp
    w1 = wfc1_ref[:, which * M:(which + 1) * M]     # 128-aligned lane slice
    w2 = wfc2_ref[which * M:(which + 1) * M, :]     # 8-aligned sublane slice
    h = gelu(mm(y, w1) + bias(2 + 3 * which, M))
    return mm(h, w2) + bias(3 + 3 * which, D)

  # ------------- load the (G, R, D) slab and flatten to (G*R, D) rows (free reshape) -------------
  x = x_ref[...].astype(f32).reshape(G * R, D)

  # ------------- window attention sublayer (self attention, or cross over neighbours) ------------
  xn = layer_norm(x)                                               # snorm1 (row-wise)
  qkv = mm(xn, wqkv_ref[...]) + bias(0, 3 * D)                     # fused q|k|v projection
  q_all, k_all, v_all = qkv[:, :D], qkv[:, D:2 * D], qkv[:, 2 * D:3 * D]

  qw = q_all.reshape(G * P, Nw, D)
  if cross:
    def shifted(a, shift):                                         # a: (G, P, Nw, D)
      parts = [a[:, (p + shift) % P:((p + shift) % P) + 1] for p in range(P)]
      return jnp.concatenate(parts, axis=1)
    k4 = k_all.reshape(G, P, Nw, D)
    v4 = v_all.reshape(G, P, Nw, D)
    # kv tokens = [window p-1 ; window p+1]  (torch.roll(+1) then roll(-1), cat on token dim)
    kw = jnp.concatenate([shifted(k4, -1), shifted(k4, +1)], axis=2).reshape(G * P, 2 * Nw, D)
    vw = jnp.concatenate([shifted(v4, -1), shifted(v4, +1)], axis=2).reshape(G * P, 2 * Nw, D)
  else:
    kw = k_all.reshape(G * P, Nw, D)
    vw = v_all.reshape(G * P, Nw, D)

  # Per-head scores batched over all (slab, window) pairs.  Head selection is a lane mask on
  # q and v (contraction over the full D lanes), so each head's p@v already lands in its own
  # lane range; the head concat + output projection collapse into one (G*R, D) @ (D, D) matmul.
  lane = lax.broadcasted_iota(jnp.int32, (1, 1, D), 2)
  attn = jnp.zeros((G * P, Nw, D), dtype=f32)
  for h in range(H):
    head_mask = (lane >= h * hd) & (lane < (h + 1) * hd)
    s = bdot(jnp.where(head_mask, qw, 0.0), kw,
             (((2,), (2,)), ((0,), (0,)))) * scale                 # (G*P, Nw, Nkv)
    s = s - jnp.max(s, axis=-1, keepdims=True)
    e = jnp.exp(s)
    p_attn = e * pl.reciprocal(jnp.sum(e, axis=-1, keepdims=True), approx=False)
    attn = attn + bdot(p_attn, jnp.where(head_mask, vw, 0.0),
                       (((2,), (1,)), ((0,), (0,))))               # (G*P, Nw, D)
  x = x + mm(attn.reshape(G * R, D), wdd_ref[:D, :]) + bias(1, D)  # single output projection

  # ------------- spatial MLP ----------------------------------------------------------------------
  x = x + mlp_branch(layer_norm(x), 0)

  # ------------- GCN across windows ---------------------------------------------------------------
  # out[g,p,n,:] = (sum_ps adj[n,p,ps] * xn[g,ps,n,:]) @ Wg + bg, with adj pre-broadcast over the
  # feature dim in the wrapper so the aggregation is a plain elementwise multiply-add.
  xg = layer_norm(x).reshape(G, P, Nw, D)
  adj_b = adj_ref[...].astype(f32)                                 # (P, P, Nw, D)
  agg_parts = []
  for p in range(P):
    agg = adj_b[p, 0][None, :, :] * xg[:, 0]
    for ps in range(1, P):
      agg = agg + adj_b[p, ps][None, :, :] * xg[:, ps]
    agg_parts.append(agg.reshape(G, 1, Nw, D))
  agg_all = jnp.concatenate(agg_parts, axis=1).reshape(G * R, D)
  x = x + mm(agg_all, wdd_ref[D:2 * D, :]) + bias(4, D)

  # ------------- node MLP -------------------------------------------------------------------------
  x = x + mlp_branch(layer_norm(x), 1)

  o_ref[...] = x.reshape(G, R, D).astype(o_ref.dtype)


def _pick_group(bt, rows_per_slab, target_rows):
  """Largest divisor G of bt with G*rows <= target and >= 2 grid steps (v7x megacore)."""
  g_max = max(1, target_rows // max(rows_per_slab, 1))
  best = 1
  for g in range(1, bt + 1):
    if g > g_max:
      break
    if bt % g:
      continue
    if bt >= 2 and bt // g < 2:
      continue
    best = g
  return best


def window_att_block(x, adj, params, *, num_heads, num, size, cross=False,
                     matmul_dtype=jnp.float32, target_rows_per_step=1024):
  B, T, S, D = x.shape
  P, Nw = num, size
  assert P * Nw == S
  assert D % num_heads == 0
  head_dim = D // num_heads
  scale = head_dim ** (-0.5)
  R = P * Nw
  M = params["smlp_w1"].shape[1]
  BT = B * T
  G = _pick_group(BT, R, target_rows_per_step)
  steps = BT // G
  f32 = jnp.float32

  x2 = x.reshape(BT, R, D)

  # ---- pack parameters into a handful of operands (fewer prologue DMAs / buffers) ----
  if cross:
    w_qkv = jnp.concatenate([params["cattn_q_w"], params["cattn_kv_w"]], axis=1)
    b_qkv = jnp.concatenate([params["cattn_q_b"], params["cattn_kv_b"]], axis=0)
    w_proj, b_proj = params["cattn_proj_w"], params["cattn_proj_b"]
  else:
    w_qkv, b_qkv = params["sattn_qkv_w"], params["sattn_qkv_b"]
    w_proj, b_proj = params["sattn_proj_w"], params["sattn_proj_b"]

  w_qkv = w_qkv.astype(f32)                                                    # (D, 3D)
  w_dd = jnp.concatenate([w_proj, params["gcn_w"]], axis=0).astype(f32)        # (2D, D)
  w_fc1 = jnp.concatenate([params["smlp_w1"], params["nmlp_w1"]], axis=1).astype(f32)  # (D, 2M)
  w_fc2 = jnp.concatenate([params["smlp_w2"], params["nmlp_w2"]], axis=0).astype(f32)  # (2M, D)

  BW = max(3 * D, M)
  bias_rows = (b_qkv, b_proj, params["smlp_b1"], params["smlp_b2"],
               params["gcn_b"], params["nmlp_b1"], params["nmlp_b2"])
  bias_pack = jnp.zeros((8, BW), f32)
  for i, b in enumerate(bias_rows):
    bias_pack = bias_pack.at[i, :b.shape[0]].set(b.astype(f32))

  # Pre-broadcast adjacency: adj_b[p, ps, n, d] = adj[n, p, ps]
  adj_b = jnp.broadcast_to(jnp.transpose(adj.astype(f32), (1, 2, 0))[:, :, :, None],
                           (P, P, Nw, D))

  args = (x2, adj_b, w_qkv, w_dd, w_fc1, w_fc2, bias_pack)

  def full_spec(a):
    zeros = (0,) * a.ndim
    return pl.BlockSpec(a.shape, lambda i, _z=zeros: _z)

  in_specs = [pl.BlockSpec((G, R, D), lambda i: (i, 0, 0))]
  in_specs += [full_spec(a) for a in args[1:]]
  out_spec = pl.BlockSpec((G, R, D), lambda i: (i, 0, 0))

  kernel = functools.partial(
      _window_block_kernel, group=G, num_windows=P, window=Nw,
      num_heads=num_heads, head_dim=head_dim, mlp_hidden=M,
      scale=scale, eps=1e-6, cross=cross, mm_dtype=matmul_dtype)

  # Advisory cost estimate so XLA schedules the (small) custom call sensibly.
  rows = G * R
  nkv = 2 * Nw if cross else Nw
  flops_per_step = (
      2 * rows * D * 3 * D                                        # fused qkv projection
      + 2 * 2 * G * P * num_heads * Nw * nkv * head_dim           # scores + p@v
      + 2 * rows * D * D                                          # fused output projection
      + 8 * rows * D * M                                          # two MLPs
      + 2 * G * P * P * Nw * D + 2 * rows * D * D)                # gcn aggregate + linear
  trans_per_step = G * P * num_heads * Nw * nkv + 2 * rows * M + 8 * rows
  bytes_accessed = (sum(int(a.size) * a.dtype.itemsize for a in args)
                    + int(x.size) * x.dtype.itemsize)

  out = pl.pallas_call(
      kernel,
      out_shape=jax.ShapeDtypeStruct((BT, R, D), x.dtype),
      grid_spec=pl.GridSpec(grid=(steps,), in_specs=in_specs, out_specs=out_spec),
      compiler_params=pltpu.CompilerParams(dimension_semantics=("parallel",)),
      cost_estimate=pl.CostEstimate(flops=int(steps * flops_per_step),
                                    transcendentals=int(steps * trans_per_step),
                                    bytes_accessed=int(bytes_accessed)),
  )(*args)
  return out.reshape(B, T, S, D)


# ----------------------------- pure-JAX reference (mirrors PyTorch) -----------------------------

def _ln(y, eps=1e-6):
  mu = jnp.mean(y, axis=-1, keepdims=True)
  var = jnp.mean(jnp.square(y - mu), axis=-1, keepdims=True)
  return (y - mu) / jnp.sqrt(var + eps)


def _attention_ref(x, w_qkv, b_qkv, w_proj, b_proj, num_heads):
  B, N, C = x.shape
  hd = C // num_heads
  qkv = (x @ w_qkv + b_qkv).reshape(B, N, 3, num_heads, hd).transpose(2, 0, 3, 1, 4)
  q, k, v = qkv[0], qkv[1], qkv[2]
  attn = jax.nn.softmax(jnp.einsum("bhqd,bhkd->bhqk", q, k) * hd ** -0.5, axis=-1)
  out = jnp.einsum("bhqk,bhkd->bhqd", attn, v).transpose(0, 2, 1, 3).reshape(B, N, C)
  return out @ w_proj + b_proj


def _cross_attention_ref(q_in, kv_in, w_q, b_q, w_kv, b_kv, w_proj, b_proj, num_heads):
  B, Nq, C = q_in.shape
  _, Nkv, _ = kv_in.shape
  hd = C // num_heads
  kv = (kv_in @ w_kv + b_kv).reshape(B, Nkv, 2, num_heads, hd).transpose(2, 0, 3, 1, 4)
  q = (q_in @ w_q + b_q).reshape(B, Nq, num_heads, hd).transpose(0, 2, 1, 3)
  k, v = kv[0], kv[1]
  attn = jax.nn.softmax(jnp.einsum("bhqd,bhkd->bhqk", q, k) * hd ** -0.5, axis=-1)
  out = jnp.einsum("bhqk,bhkd->bhqd", attn, v).transpose(0, 2, 1, 3).reshape(B, Nq, C)
  return out @ w_proj + b_proj


def _mlp_ref(x, w1, b1, w2, b2):
  return jax.nn.gelu(x @ w1 + b1, approximate=False) @ w2 + b2


def window_att_block_reference(x, adj, params, *, num_heads, num, size, cross=False):
  B, T, S, D = x.shape
  P, N = num, size
  x = x.reshape(B, T, P, N, D)
  if cross:
    x_fwd = jnp.roll(x, shift=1, axis=2)
    x_bwd = jnp.roll(x, shift=-1, axis=2)
    q = _ln(x.reshape(B * T * P, N, D))
    kv = _ln(jnp.concatenate([x_fwd, x_bwd], axis=3).reshape(B * T * P, 2 * N, D))
    att = _cross_attention_ref(q, kv,
                               params["cattn_q_w"], params["cattn_q_b"],
                               params["cattn_kv_w"], params["cattn_kv_b"],
                               params["cattn_proj_w"], params["cattn_proj_b"], num_heads)
    x = x + att.reshape(B, T, P, N, D)
  else:
    qkv = _ln(x.reshape(B * T * P, N, D))
    att = _attention_ref(qkv, params["sattn_qkv_w"], params["sattn_qkv_b"],
                         params["sattn_proj_w"], params["sattn_proj_b"], num_heads)
    x = x + att.reshape(B, T, P, N, D)
  x = x + _mlp_ref(_ln(x), params["smlp_w1"], params["smlp_b1"],
                   params["smlp_w2"], params["smlp_b2"])
  qkv = _ln(jnp.swapaxes(x, 2, 3).reshape(B * T, N, P, D))
  gcn = jnp.matmul(adj[None, ...], qkv) @ params["gcn_w"] + params["gcn_b"]
  x = x + jnp.swapaxes(gcn.reshape(B, T, N, P, D), 2, 3)
  x = x + _mlp_ref(_ln(x), params["nmlp_w1"], params["nmlp_b1"],
                   params["nmlp_w2"], params["nmlp_b2"])
  return x.reshape(B, T, S, D)


if __name__ == "__main__":
  # Small shapes: B=2, T=2, num(P)=2 windows of size(N)=8, hidden=32, heads=4, mlp_ratio=4.
  B, T, P, Nw, D, H = 2, 2, 2, 8, 32, 4
  M = 4 * D

  key = jax.random.PRNGKey(0)
  keys = jax.random.split(key, 12)
  ki = iter(keys)

  def lin(k, fan_in, fan_out):
    kw, kb = jax.random.split(k)
    lim = fan_in ** -0.5
    w = jax.random.uniform(kw, (fan_in, fan_out), jnp.float32, -lim, lim)
    b = jax.random.uniform(kb, (fan_out,), jnp.float32, -lim, lim)
    return w, b

  params = {}
  params["sattn_qkv_w"], params["sattn_qkv_b"] = lin(next(ki), D, 3 * D)
  params["sattn_proj_w"], params["sattn_proj_b"] = lin(next(ki), D, D)
  params["cattn_q_w"], params["cattn_q_b"] = lin(next(ki), D, D)
  params["cattn_kv_w"], params["cattn_kv_b"] = lin(next(ki), D, 2 * D)
  params["cattn_proj_w"], params["cattn_proj_b"] = lin(next(ki), D, D)
  params["smlp_w1"], params["smlp_b1"] = lin(next(ki), D, M)
  params["smlp_w2"], params["smlp_b2"] = lin(next(ki), M, D)
  params["gcn_w"], params["gcn_b"] = lin(next(ki), D, D)
  params["nmlp_w1"], params["nmlp_b1"] = lin(next(ki), D, M)
  params["nmlp_w2"], params["nmlp_b2"] = lin(next(ki), M, D)

  x = jax.random.normal(next(ki), (B, T, P * Nw, D), dtype=jnp.float32)
  adj = jax.random.normal(next(ki), (Nw, P, P), dtype=jnp.float32) * (P ** -0.5)

  # f32 matmul path (default): parity with the PyTorch module.
  for cross in (False, True):
    out = window_att_block(x, adj, params, num_heads=H, num=P, size=Nw, cross=cross)
    out = jax.block_until_ready(out)
    ref = window_att_block_reference(x, adj, params, num_heads=H, num=P, size=Nw, cross=cross)
    assert out.shape == (B, T, P * Nw, D)
    assert jnp.allclose(out, ref, atol=2e-2, rtol=2e-2), f"Pallas mismatch (cross={cross})"

  # bf16 matmul operands with f32 accumulation: the v6e/v7x fast path (loose sanity check only).
  out_bf16 = window_att_block(x, adj, params, num_heads=H, num=P, size=Nw, cross=False,
                              matmul_dtype=jnp.bfloat16)
  out_bf16 = jax.block_until_ready(out_bf16)
  ref0 = window_att_block_reference(x, adj, params, num_heads=H, num=P, size=Nw, cross=False)
  assert bool(jnp.all(jnp.isfinite(out_bf16)))
  assert float(jnp.max(jnp.abs(out_bf16 - ref0))) < 0.5, "bf16 path diverged"

  print("KERNEL_OK")
</pallas_src>

<mosaic_0001>
module attributes {stable_mosaic.version = 11 : i64} {
  func.func @_window_block_kernel(%arg0: i32, %arg1: memref<2x16x32xf32, #tpu.memory_space<vmem>>, %arg2: memref<2x2x8x32xf32, #tpu.memory_space<vmem>>, %arg3: memref<32x96xf32, #tpu.memory_space<vmem>>, %arg4: memref<64x32xf32, #tpu.memory_space<vmem>>, %arg5: memref<32x256xf32, #tpu.memory_space<vmem>>, %arg6: memref<256x32xf32, #tpu.memory_space<vmem>>, %arg7: memref<8x128xf32, #tpu.memory_space<vmem>>, %arg8: memref<2x16x32xf32, #tpu.memory_space<vmem>>) attributes {dimension_semantics = [#tpu.dimension_semantics<parallel>], iteration_bounds = array<i64: 2>, scalar_prefetch = 0 : i64, scratch_operands = 0 : i64, tpu.core_type = #tpu.core_type<tc>, window_params = [{transform_indices = @transform_0, window_bounds = array<i64: 2, 16, 32>}, {pipeline_mode = #tpu.pipeline_mode<synchronous>, transform_indices = @transform_1, window_bounds = array<i64: 2, 2, 8, 32>}, {pipeline_mode = #tpu.pipeline_mode<synchronous>, transform_indices = @transform_2, window_bounds = array<i64: 32, 96>}, {pipeline_mode = #tpu.pipeline_mode<synchronous>, transform_indices = @transform_3, window_bounds = array<i64: 64, 32>}, {pipeline_mode = #tpu.pipeline_mode<synchronous>, transform_indices = @transform_4, window_bounds = array<i64: 32, 256>}, {pipeline_mode = #tpu.pipeline_mode<synchronous>, transform_indices = @transform_5, window_bounds = array<i64: 256, 32>}, {pipeline_mode = #tpu.pipeline_mode<synchronous>, transform_indices = @transform_6, window_bounds = array<i64: 8, 128>}, {transform_indices = @transform_7, window_bounds = array<i64: 2, 16, 32>}]} {
    %c0 = arith.constant 0 : index
    %c0_0 = arith.constant 0 : index
    %c0_1 = arith.constant 0 : index
    %0 = vector.load %arg1[%c0, %c0_0, %c0_1] : memref<2x16x32xf32, #tpu.memory_space<vmem>>, vector<2x16x32xf32>
    %1 = vector.shape_cast %0 : vector<2x16x32xf32> to vector<32x32xf32>
    %cst = arith.constant dense<0.000000e+00> : vector<32xf32>
    %2 = vector.multi_reduction <add>, %1, %cst [1] : vector<32x32xf32> to vector<32xf32>
    %3 = vector.shape_cast %2 : vector<32xf32> to vector<32x1xf32>
    %cst_2 = arith.constant 3.200000e+01 : f32
    %4 = vector.broadcast %cst_2 : f32 to vector<32x1xf32>
    %5 = arith.divf %3, %4 : vector<32x1xf32>
    %6 = vector.broadcast %5 : vector<32x1xf32> to vector<32x32xf32>
    %7 = arith.subf %1, %6 : vector<32x32xf32>
    %8 = arith.mulf %7, %7 : vector<32x32xf32>
    %cst_3 = arith.constant dense<0.000000e+00> : vector<32xf32>
    %9 = vector.multi_reduction <add>, %8, %cst_3 [1] : vector<32x32xf32> to vector<32xf32>
    %10 = vector.shape_cast %9 : vector<32xf32> to vector<32x1xf32>
    %cst_4 = arith.constant 3.200000e+01 : f32
    %11 = vector.broadcast %cst_4 : f32 to vector<32x1xf32>
    %12 = arith.divf %10, %11 : vector<32x1xf32>
    %13 = vector.broadcast %5 : vector<32x1xf32> to vector<32x32xf32>
    %14 = arith.subf %1, %13 : vector<32x32xf32>
    %cst_5 = arith.constant 9.99999997E-7 : f32
    %15 = vector.broadcast %cst_5 : f32 to vector<32x1xf32>
    %16 = arith.addf %12, %15 : vector<32x1xf32>
    %17 = math.rsqrt %16 : vector<32x1xf32>
    %18 = vector.broadcast %17 : vector<32x1xf32> to vector<32x32xf32>
    %19 = arith.mulf %14, %18 : vector<32x32xf32>
    %c0_6 = arith.constant 0 : index
    %c0_7 = arith.constant 0 : index
    %20 = vector.load %arg3[%c0_6, %c0_7] : memref<32x96xf32, #tpu.memory_space<vmem>>, vector<32x96xf32>
    %cst_8 = arith.constant dense<0.000000e+00> : vector<32x96xf32>
    %21 = tpu.matmul %19, %20, %cst_8 {dimension_numbers = #tpu.dot_dimension_numbers<[1], [0], [0], [1], [0, 0, 1, 1], [], []>} : vector<32x32xf32>, vector<32x96xf32>, vector<32x96xf32> -> vector<32x96xf32>
    %c0_9 = arith.constant 0 : index
    %c0_10 = arith.constant 0 : index
    %22 = vector.load %arg7[%c0_9, %c0_10] : memref<8x128xf32, #tpu.memory_space<vmem>>, vector<1x96xf32>
    %23 = vector.broadcast %22 : vector<1x96xf32> to vector<32x96xf32>
    %24 = arith.addf %21, %23 : vector<32x96xf32>
    %25 = vector.extract_strided_slice %24 {offsets = [0, 0], sizes = [32, 32], strides = [1, 1]} : vector<32x96xf32> to vector<32x32xf32>
    %26 = vector.extract_strided_slice %24 {offsets = [0, 32], sizes = [32, 32], strides = [1, 1]} : vector<32x96xf32> to vector<32x32xf32>
    %27 = vector.extract_strided_slice %24 {offsets = [0, 64], sizes = [32, 32], strides = [1, 1]} : vector<32x96xf32> to vector<32x32xf32>
    %28 = vector.shape_cast %25 : vector<32x32xf32> to vector<4x8x32xf32>
    %29 = vector.shape_cast %26 : vector<32x32xf32> to vector<4x8x32xf32>
    %30 = vector.shape_cast %27 : vector<32x32xf32> to vector<4x8x32xf32>
    %31 = tpu.iota {dimensions = array<i32: 2>} : vector<1x1x32xi32>
    %cst_11 = arith.constant 0.000000e+00 : f32
    %32 = vector.broadcast %cst_11 : f32 to vector<4x8x32xf32>
    %c0_i32 = arith.constant 0 : i32
    %33 = vector.broadcast %c0_i32 : i32 to vector<1x1x32xi32>
    %34 = arith.cmpi sge, %31, %33 : vector<1x1x32xi32>
    %c8_i32 = arith.constant 8 : i32
    %35 = vector.broadcast %c8_i32 : i32 to vector<1x1x32xi32>
    %36 = arith.cmpi slt, %31, %35 : vector<1x1x32xi32>
    %37 = arith.andi %34, %36 : vector<1x1x32xi1>
    %cst_12 = arith.constant 0.000000e+00 : f32
    %38 = vector.shape_cast %37 : vector<1x1x32xi1> to vector<1x1x32xi1>
    %39 = vector.broadcast %38 : vector<1x1x32xi1> to vector<4x8x32xi1>
    %40 = vector.broadcast %cst_12 : f32 to vector<4x8x32xf32>
    %41 = arith.select %39, %28, %40 : vector<4x8x32xi1>, vector<4x8x32xf32>
    %cst_13 = arith.constant dense<0.000000e+00> : vector<4x8x8xf32>
    %42 = tpu.matmul %41, %29, %cst_13 {dimension_numbers = #tpu.dot_dimension_numbers<[2], [2], [1], [1], [0, 0, 0, 1, 1, 1], [0], [0]>} : vector<4x8x32xf32>, vector<4x8x32xf32>, vector<4x8x8xf32> -> vector<4x8x8xf32>
    %cst_14 = arith.constant 0.353553385 : f32
    %43 = vector.broadcast %cst_14 : f32 to vector<4x8x8xf32>
    %44 = arith.mulf %42, %43 : vector<4x8x8xf32>
    %cst_15 = arith.constant dense<0xFF800000> : vector<4x8xf32>
    %45 = vector.multi_reduction <maximumf>, %44, %cst_15 [2] : vector<4x8x8xf32> to vector<4x8xf32>
    %46 = vector.shape_cast %45 : vector<4x8xf32> to vector<4x8x1xf32>
    %47 = vector.broadcast %46 : vector<4x8x1xf32> to vector<4x8x8xf32>
    %48 = arith.subf %44, %47 : vector<4x8x8xf32>
    %49 = math.exp %48 : vector<4x8x8xf32>
    %cst_16 = arith.constant dense<0.000000e+00> : vector<4x8xf32>
    %50 = vector.multi_reduction <add>, %49, %cst_16 [2] : vector<4x8x8xf32> to vector<4x8xf32>
    %51 = vector.shape_cast %50 : vector<4x8xf32> to vector<4x8x1xf32>
    %52 = tpu.reciprocal %51 : vector<4x8x1xf32> -> vector<4x8x1xf32>
    %53 = vector.broadcast %52 : vector<4x8x1xf32> to vector<4x8x8xf32>
    %54 = arith.mulf %49, %53 : vector<4x8x8xf32>
    %cst_17 = arith.constant 0.000000e+00 : f32
    %55 = vector.shape_cast %37 : vector<1x1x32xi1> to vector<1x1x32xi1>
    %56 = vector.broadcast %55 : vector<1x1x32xi1> to vector<4x8x32xi1>
    %57 = vector.broadcast %cst_17 : f32 to vector<4x8x32xf32>
    %58 = arith.select %56, %30, %57 : vector<4x8x32xi1>, vector<4x8x32xf32>
    %cst_18 = arith.constant dense<0.000000e+00> : vector<4x8x32xf32>
    %59 = tpu.matmul %54, %58, %cst_18 {dimension_numbers = #tpu.dot_dimension_numbers<[2], [1], [1], [2], [0, 0, 0, 1, 1, 2], [0], [0]>} : vector<4x8x8xf32>, vector<4x8x32xf32>, vector<4x8x32xf32> -> vector<4x8x32xf32>
    %60 = arith.addf %32, %59 : vector<4x8x32xf32>
    %c8_i32_19 = arith.constant 8 : i32
    %61 = vector.broadcast %c8_i32_19 : i32 to vector<1x1x32xi32>
    %62 = arith.cmpi sge, %31, %61 : vector<1x1x32xi32>
    %c16_i32 = arith.constant 16 : i32
    %63 = vector.broadcast %c16_i32 : i32 to vector<1x1x32xi32>
    %64 = arith.cmpi slt, %31, %63 : vector<1x1x32xi32>
    %65 = arith.andi %62, %64 : vector<1x1x32xi1>
    %cst_20 = arith.constant 0.000000e+00 : f32
    %66 = vector.shape_cast %65 : vector<1x1x32xi1> to vector<1x1x32xi1>
    %67 = vector.broadcast %66 : vector<1x1x32xi1> to vector<4x8x32xi1>
    %68 = vector.broadcast %cst_20 : f32 to vector<4x8x32xf32>
    %69 = arith.select %67, %28, %68 : vector<4x8x32xi1>, vector<4x8x32xf32>
    %cst_21 = arith.constant dense<0.000000e+00> : vector<4x8x8xf32>
    %70 = tpu.matmul %69, %29, %cst_21 {dimension_numbers = #tpu.dot_dimension_numbers<[2], [2], [1], [1], [0, 0, 0, 1, 1, 1], [0], [0]>} : vector<4x8x32xf32>, vector<4x8x32xf32>, vector<4x8x8xf32> -> vector<4x8x8xf32>
    %cst_22 = arith.constant 0.353553385 : f32
    %71 = vector.broadcast %cst_22 : f32 to vector<4x8x8xf32>
    %72 = arith.mulf %70, %71 : vector<4x8x8xf32>
    %cst_23 = arith.constant dense<0xFF800000> : vector<4x8xf32>
    %73 = vector.multi_reduction <maximumf>, %72, %cst_23 [2] : vector<4x8x8xf32> to vector<4x8xf32>
    %74 = vector.shape_cast %73 : vector<4x8xf32> to vector<4x8x1xf32>
    %75 = vector.broadcast %74 : vector<4x8x1xf32> to vector<4x8x8xf32>
    %76 = arith.subf %72, %75 : vector<4x8x8xf32>
    %77 = math.exp %76 : vector<4x8x8xf32>
    %cst_24 = arith.constant dense<0.000000e+00> : vector<4x8xf32>
    %78 = vector.multi_reduction <add>, %77, %cst_24 [2] : vector<4x8x8xf32> to vector<4x8xf32>
    %79 = vector.shape_cast %78 : vector<4x8xf32> to vector<4x8x1xf32>
    %80 = tpu.reciprocal %79 : vector<4x8x1xf32> -> vector<4x8x1xf32>
    %81 = vector.broadcast %80 : vector<4x8x1xf32> to vector<4x8x8xf32>
    %82 = arith.mulf %77, %81 : vector<4x8x8xf32>
    %cst_25 = arith.constant 0.000000e+00 : f32
    %83 = vector.shape_cast %65 : vector<1x1x32xi1> to vector<1x1x32xi1>
    %84 = vector.broadcast %83 : vector<1x1x32xi1> to vector<4x8x32xi1>
    %85 = vector.broadcast %cst_25 : f32 to vector<4x8x32xf32>
    %86 = arith.select %84, %30, %85 : vector<4x8x32xi1>, vector<4x8x32xf32>
    %cst_26 = arith.constant dense<0.000000e+00> : vector<4x8x32xf32>
    %87 = tpu.matmul %82, %86, %cst_26 {dimension_numbers = #tpu.dot_dimension_numbers<[2], [1], [1], [2], [0, 0, 0, 1, 1, 2], [0], [0]>} : vector<4x8x8xf32>, vector<4x8x32xf32>, vector<4x8x32xf32> -> vector<4x8x32xf32>
    %88 = arith.addf %60, %87 : vector<4x8x32xf32>
    %c16_i32_27 = arith.constant 16 : i32
    %89 = vector.broadcast %c16_i32_27 : i32 to vector<1x1x32xi32>
    %90 = arith.cmpi sge, %31, %89 : vector<1x1x32xi32>
    %c24_i32 = arith.constant 24 : i32
    %91 = vector.broadcast %c24_i32 : i32 to vector<1x1x32xi32>
    %92 = arith.cmpi slt, %31, %91 : vector<1x1x32xi32>
    %93 = arith.andi %90, %92 : vector<1x1x32xi1>
    %cst_28 = arith.constant 0.000000e+00 : f32
    %94 = vector.shape_cast %93 : vector<1x1x32xi1> to vector<1x1x32xi1>
    %95 = vector.broadcast %94 : vector<1x1x32xi1> to vector<4x8x32xi1>
    %96 = vector.broadcast %cst_28 : f32 to vector<4x8x32xf32>
    %97 = arith.select %95, %28, %96 : vector<4x8x32xi1>, vector<4x8x32xf32>
    %cst_29 = arith.constant dense<0.000000e+00> : vector<4x8x8xf32>
    %98 = tpu.matmul %97, %29, %cst_29 {dimension_numbers = #tpu.dot_dimension_numbers<[2], [2], [1], [1], [0, 0, 0, 1, 1, 1], [0], [0]>} : vector<4x8x32xf32>, vector<4x8x32xf32>, vector<4x8x8xf32> -> vector<4x8x8xf32>
    %cst_30 = arith.constant 0.353553385 : f32
    %99 = vector.broadcast %cst_30 : f32 to vector<4x8x8xf32>
    %100 = arith.mulf %98, %99 : vector<4x8x8xf32>
    %cst_31 = arith.constant dense<0xFF800000> : vector<4x8xf32>
    %101 = vector.multi_reduction <maximumf>, %100, %cst_31 [2] : vector<4x8x8xf32> to vector<4x8xf32>
    %102 = vector.shape_cast %101 : vector<4x8xf32> to vector<4x8x1xf32>
    %103 = vector.broadcast %102 : vector<4x8x1xf32> to vector<4x8x8xf32>
    %104 = arith.subf %100, %103 : vector<4x8x8xf32>
    %105 = math.exp %104 : vector<4x8x8xf32>
    %cst_32 = arith.constant dense<0.000000e+00> : vector<4x8xf32>
    %106 = vector.multi_reduction <add>, %105, %cst_32 [2] : vector<4x8x8xf32> to vector<4x8xf32>
    %107 = vector.shape_cast %106 : vector<4x8xf32> to vector<4x8x1xf32>
    %108 = tpu.reciprocal %107 : vector<4x8x1xf32> -> vector<4x8x1xf32>
    %109 = vector.broadcast %108 : vector<4x8x1xf32> to vector<4x8x8xf32>
    %110 = arith.mulf %105, %109 : vector<4x8x8xf32>
    %cst_33 = arith.constant 0.000000e+00 : f32
    %111 = vector.shape_cast %93 : vector<1x1x32xi1> to vector<1x1x32xi1>
    %112 = vector.broadcast %111 : vector<1x1x32xi1> to vector<4x8x32xi1>
    %113 = vector.broadcast %cst_33 : f32 to vector<4x8x32xf32>
    %114 = arith.select %112, %30, %113 : vector<4x8x32xi1>, vector<4x8x32xf32>
    %cst_34 = arith.constant dense<0.000000e+00> : vector<4x8x32xf32>
    %115 = tpu.matmul %110, %114, %cst_34 {dimension_numbers = #tpu.dot_dimension_numbers<[2], [1], [1], [2], [0, 0, 0, 1, 1, 2], [0], [0]>} : vector<4x8x8xf32>, vector<4x8x32xf32>, vector<4x8x32xf32> -> vector<4x8x32xf32>
    %116 = arith.addf %88, %115 : vector<4x8x32xf32>
    %c24_i32_35 = arith.constant 24 : i32
    %117 = vector.broadcast %c24_i32_35 : i32 to vector<1x1x32xi32>
    %118 = arith.cmpi sge, %31, %117 : vector<1x1x32xi32>
    %c32_i32 = arith.constant 32 : i32
    %119 = vector.broadcast %c32_i32 : i32 to vector<1x1x32xi32>
    %120 = arith.cmpi slt, %31, %119 : vector<1x1x32xi32>
    %121 = arith.andi %118, %120 : vector<1x1x32xi1>
    %cst_36 = arith.constant 0.000000e+00 : f32
    %122 = vector.shape_cast %121 : vector<1x1x32xi1> to vector<1x1x32xi1>
    %123 = vector.broadcast %122 : vector<1x1x32xi1> to vector<4x8x32xi1>
    %124 = vector.broadcast %cst_36 : f32 to vector<4x8x32xf32>
    %125 = arith.select %123, %28, %124 : vector<4x8x32xi1>, vector<4x8x32xf32>
    %cst_37 = arith.constant dense<0.000000e+00> : vector<4x8x8xf32>
    %126 = tpu.matmul %125, %29, %cst_37 {dimension_numbers = #tpu.dot_dimension_numbers<[2], [2], [1], [1], [0, 0, 0, 1, 1, 1], [0], [0]>} : vector<4x8x32xf32>, vector<4x8x32xf32>, vector<4x8x8xf32> -> vector<4x8x8xf32>
    %cst_38 = arith.constant 0.353553385 : f32
    %127 = vector.broadcast %cst_38 : f32 to vector<4x8x8xf32>
    %128 = arith.mulf %126, %127 : vector<4x8x8xf32>
    %cst_39 = arith.constant dense<0xFF800000> : vector<4x8xf32>
    %129 = vector.multi_reduction <maximumf>, %128, %cst_39 [2] : vector<4x8x8xf32> to vector<4x8xf32>
    %130 = vector.shape_cast %129 : vector<4x8xf32> to vector<4x8x1xf32>
    %131 = vector.broadcast %130 : vector<4x8x1xf32> to vector<4x8x8xf32>
    %132 = arith.subf %128, %131 : vector<4x8x8xf32>
    %133 = math.exp %132 : vector<4x8x8xf32>
    %cst_40 = arith.constant dense<0.000000e+00> : vector<4x8xf32>
    %134 = vector.multi_reduction <add>, %133, %cst_40 [2] : vector<4x8x8xf32> to vector<4x8xf32>
    %135 = vector.shape_cast %134 : vector<4x8xf32> to vector<4x8x1xf32>
    %136 = tpu.reciprocal %135 : vector<4x8x1xf32> -> vector<4x8x1xf32>
    %137 = vector.broadcast %136 : vector<4x8x1xf32> to vector<4x8x8xf32>
    %138 = arith.mulf %133, %137 : vector<4x8x8xf32>
    %cst_41 = arith.constant 0.000000e+00 : f32
    %139 = vector.shape_cast %121 : vector<1x1x32xi1> to vector<1x1x32xi1>
    %140 = vector.broadcast %139 : vector<1x1x32xi1> to vector<4x8x32xi1>
    %141 = vector.broadcast %cst_41 : f32 to vector<4x8x32xf32>
    %142 = arith.select %140, %30, %141 : vector<4x8x32xi1>, vector<4x8x32xf32>
    %cst_42 = arith.constant dense<0.000000e+00> : vector<4x8x32xf32>
    %143 = tpu.matmul %138, %142, %cst_42 {dimension_numbers = #tpu.dot_dimension_numbers<[2], [1], [1], [2], [0, 0, 0, 1, 1, 2], [0], [0]>} : vector<4x8x8xf32>, vector<4x8x32xf32>, vector<4x8x32xf32> -> vector<4x8x32xf32>
    %144 = arith.addf %116, %143 : vector<4x8x32xf32>
    %145 = vector.shape_cast %144 : vector<4x8x32xf32> to vector<32x32xf32>
    %c0_43 = arith.constant 0 : index
    %c0_44 = arith.constant 0 : index
    %146 = vector.load %arg4[%c0_43, %c0_44] : memref<64x32xf32, #tpu.memory_space<vmem>>, vector<32x32xf32>
    %cst_45 = arith.constant dense<0.000000e+00> : vector<32x32xf32>
    %147 = tpu.matmul %145, %146, %cst_45 {dimension_numbers = #tpu.dot_dimension_numbers<[1], [0], [0], [1], [0, 0, 1, 1], [], []>} : vector<32x32xf32>, vector<32x32xf32>, vector<32x32xf32> -> vector<32x32xf32>
    %148 = arith.addf %1, %147 : vector<32x32xf32>
    %c1 = arith.constant 1 : index
    %c0_46 = arith.constant 0 : index
    %149 = vector.load %arg7[%c1, %c0_46] : memref<8x128xf32, #tpu.memory_space<vmem>>, vector<1x32xf32>
    %150 = vector.broadcast %149 : vector<1x32xf32> to vector<32x32xf32>
    %151 = arith.addf %148, %150 : vector<32x32xf32>
    %cst_47 = arith.constant dense<0.000000e+00> : vector<32xf32>
    %152 = vector.multi_reduction <add>, %151, %cst_47 [1] : vector<32x32xf32> to vector<32xf32>
    %153 = vector.shape_cast %152 : vector<32xf32> to vector<32x1xf32>
    %cst_48 = arith.constant 3.200000e+01 : f32
    %154 = vector.broadcast %cst_48 : f32 to vector<32x1xf32>
    %155 = arith.divf %153, %154 : vector<32x1xf32>
    %156 = vector.broadcast %155 : vector<32x1xf32> to vector<32x32xf32>
    %157 = arith.subf %151, %156 : vector<32x32xf32>
    %158 = arith.mulf %157, %157 : vector<32x32xf32>
    %cst_49 = arith.constant dense<0.000000e+00> : vector<32xf32>
    %159 = vector.multi_reduction <add>, %158, %cst_49 [1] : vector<32x32xf32> to vector<32xf32>
    %160 = vector.shape_cast %159 : vector<32xf32> to vector<32x1xf32>
    %cst_50 = arith.constant 3.200000e+01 : f32
    %161 = vector.broadcast %cst_50 : f32 to vector<32x1xf32>
    %162 = arith.divf %160, %161 : vector<32x1xf32>
    %163 = vector.broadcast %155 : vector<32x1xf32> to vector<32x32xf32>
    %164 = arith.subf %151, %163 : vector<32x32xf32>
    %cst_51 = arith.constant 9.99999997E-7 : f32
    %165 = vector.broadcast %cst_51 : f32 to vector<32x1xf32>
    %166 = arith.addf %162, %165 : vector<32x1xf32>
    %167 = math.rsqrt %166 : vector<32x1xf32>
    %168 = vector.broadcast %167 : vector<32x1xf32> to vector<32x32xf32>
    %169 = arith.mulf %164, %168 : vector<32x32xf32>
    %c0_52 = arith.constant 0 : index
    %c0_53 = arith.constant 0 : index
    %170 = vector.load %arg5[%c0_52, %c0_53] : memref<32x256xf32, #tpu.memory_space<vmem>>, vector<32x128xf32>
    %c0_54 = arith.constant 0 : index
    %c0_55 = arith.constant 0 : index
    %171 = vector.load %arg6[%c0_54, %c0_55] : memref<256x32xf32, #tpu.memory_space<vmem>>, vector<128x32xf32>
    %cst_56 = arith.constant dense<0.000000e+00> : vector<32x128xf32>
    %172 = tpu.matmul %169, %170, %cst_56 {dimension_numbers = #tpu.dot_dimension_numbers<[1], [0], [0], [1], [0, 0, 1, 1], [], []>} : vector<32x32xf32>, vector<32x128xf32>, vector<32x128xf32> -> vector<32x128xf32>
    %c2 = arith.constant 2 : index
    %c0_57 = arith.constant 0 : index
    %173 = vector.load %arg7[%c2, %c0_57] : memref<8x128xf32, #tpu.memory_space<vmem>>, vector<1x128xf32>
    %174 = vector.broadcast %173 : vector<1x128xf32> to vector<32x128xf32>
    %175 = arith.addf %172, %174 : vector<32x128xf32>
    %cst_58 = arith.constant 5.000000e-01 : f32
    %176 = vector.broadcast %cst_58 : f32 to vector<32x128xf32>
    %177 = arith.mulf %176, %175 : vector<32x128xf32>
    %cst_59 = arith.constant 0.707106769 : f32
    %178 = vector.broadcast %cst_59 : f32 to vector<32x128xf32>
    %179 = arith.mulf %175, %178 : vector<32x128xf32>
    %cst_60 = arith.constant 0.000000e+00 : f32
    %180 = vector.broadcast %cst_60 : f32 to vector<32x128xf32>
    %181 = arith.cmpf oge, %179, %180 : vector<32x128xf32>
    %cst_61 = arith.constant 1.000000e+00 : f32
    %cst_62 = arith.constant -1.000000e+00 : f32
    %182 = vector.broadcast %cst_61 : f32 to vector<32x128xf32>
    %183 = vector.broadcast %cst_62 : f32 to vector<32x128xf32>
    %184 = arith.select %181, %182, %183 : vector<32x128xi1>, vector<32x128xf32>
    %185 = math.absf %179 : vector<32x128xf32>
    %cst_63 = arith.constant 0.327591091 : f32
    %186 = vector.broadcast %cst_63 : f32 to vector<32x128xf32>
    %187 = arith.mulf %186, %185 : vector<32x128xf32>
    %cst_64 = arith.constant 1.000000e+00 : f32
    %188 = vector.broadcast %cst_64 : f32 to vector<32x128xf32>
    %189 = arith.addf %188, %187 : vector<32x128xf32>
    %cst_65 = arith.constant 1.000000e+00 : f32
    %190 = vector.broadcast %cst_65 : f32 to vector<32x128xf32>
    %191 = arith.divf %190, %189 : vector<32x128xf32>
    %cst_66 = arith.constant 1.06140542 : f32
    %192 = vector.broadcast %cst_66 : f32 to vector<32x128xf32>
    %193 = arith.mulf %192, %191 : vector<32x128xf32>
    %cst_67 = arith.constant -1.45315206 : f32
    %194 = vector.broadcast %cst_67 : f32 to vector<32x128xf32>
    %195 = arith.addf %193, %194 : vector<32x128xf32>
    %196 = arith.mulf %195, %191 : vector<32x128xf32>
    %cst_68 = arith.constant 1.42141378 : f32
    %197 = vector.broadcast %cst_68 : f32 to vector<32x128xf32>
    %198 = arith.addf %196, %197 : vector<32x128xf32>
    %199 = arith.mulf %198, %191 : vector<32x128xf32>
    %cst_69 = arith.constant -0.284496725 : f32
    %200 = vector.broadcast %cst_69 : f32 to vector<32x128xf32>
    %201 = arith.addf %199, %200 : vector<32x128xf32>
    %202 = arith.mulf %201, %191 : vector<32x128xf32>
    %cst_70 = arith.constant 0.254829586 : f32
    %203 = vector.broadcast %cst_70 : f32 to vector<32x128xf32>
    %204 = arith.addf %202, %203 : vector<32x128xf32>
    %205 = arith.mulf %204, %191 : vector<32x128xf32>
    %cst_71 = arith.constant 0.000000e+00 : f32
    %206 = vector.broadcast %cst_71 : f32 to vector<32x128xf32>
    %207 = arith.subf %206, %185 : vector<32x128xf32>
    %208 = arith.mulf %207, %185 : vector<32x128xf32>
    %209 = math.exp %208 : vector<32x128xf32>
    %210 = arith.mulf %205, %209 : vector<32x128xf32>
    %cst_72 = arith.constant 1.000000e+00 : f32
    %211 = vector.broadcast %cst_72 : f32 to vector<32x128xf32>
    %212 = arith.subf %211, %210 : vector<32x128xf32>
    %213 = arith.mulf %184, %212 : vector<32x128xf32>
    %cst_73 = arith.constant 1.000000e+00 : f32
    %214 = vector.broadcast %cst_73 : f32 to vector<32x128xf32>
    %215 = arith.addf %214, %213 : vector<32x128xf32>
    %216 = arith.mulf %177, %215 : vector<32x128xf32>
    %cst_74 = arith.constant dense<0.000000e+00> : vector<32x32xf32>
    %217 = tpu.matmul %216, %171, %cst_74 {dimension_numbers = #tpu.dot_dimension_numbers<[1], [0], [0], [1], [0, 0, 1, 1], [], []>} : vector<32x128xf32>, vector<128x32xf32>, vector<32x32xf32> -> vector<32x32xf32>
    %c3 = arith.constant 3 : index
    %c0_75 = arith.constant 0 : index
    %218 = vector.load %arg7[%c3, %c0_75] : memref<8x128xf32, #tpu.memory_space<vmem>>, vector<1x32xf32>
    %219 = vector.broadcast %218 : vector<1x32xf32> to vector<32x32xf32>
    %220 = arith.addf %217, %219 : vector<32x32xf32>
    %221 = arith.addf %151, %220 : vector<32x32xf32>
    %cst_76 = arith.constant dense<0.000000e+00> : vector<32xf32>
    %222 = vector.multi_reduction <add>, %221, %cst_76 [1] : vector<32x32xf32> to vector<32xf32>
    %223 = vector.shape_cast %222 : vector<32xf32> to vector<32x1xf32>
    %cst_77 = arith.constant 3.200000e+01 : f32
    %224 = vector.broadcast %cst_77 : f32 to vector<32x1xf32>
    %225 = arith.divf %223, %224 : vector<32x1xf32>
    %226 = vector.broadcast %225 : vector<32x1xf32> to vector<32x32xf32>
    %227 = arith.subf %221, %226 : vector<32x32xf32>
    %228 = arith.mulf %227, %227 : vector<32x32xf32>
    %cst_78 = arith.constant dense<0.000000e+00> : vector<32xf32>
    %229 = vector.multi_reduction <add>, %228, %cst_78 [1] : vector<32x32xf32> to vector<32xf32>
    %230 = vector.shape_cast %229 : vector<32xf32> to vector<32x1xf32>
    %cst_79 = arith.constant 3.200000e+01 : f32
    %231 = vector.broadcast %cst_79 : f32 to vector<32x1xf32>
    %232 = arith.divf %230, %231 : vector<32x1xf32>
    %233 = vector.broadcast %225 : vector<32x1xf32> to vector<32x32xf32>
    %234 = arith.subf %221, %233 : vector<32x32xf32>
    %cst_80 = arith.constant 9.99999997E-7 : f32
    %235 = vector.broadcast %cst_80 : f32 to vector<32x1xf32>
    %236 = arith.addf %232, %235 : vector<32x1xf32>
    %237 = math.rsqrt %236 : vector<32x1xf32>
    %238 = vector.broadcast %237 : vector<32x1xf32> to vector<32x32xf32>
    %239 = arith.mulf %234, %238 : vector<32x32xf32>
    %240 = vector.shape_cast %239 : vector<32x32xf32> to vector<2x2x8x32xf32>
    %c0_81 = arith.constant 0 : index
    %c0_82 = arith.constant 0 : index
    %c0_83 = arith.constant 0 : index
    %c0_84 = arith.constant 0 : index
    %241 = vector.load %arg2[%c0_81, %c0_82, %c0_83, %c0_84] : memref<2x2x8x32xf32, #tpu.memory_space<vmem>>, vector<2x2x8x32xf32>
    %242 = vector.extract_strided_slice %241 {offsets = [0, 0, 0, 0], sizes = [1, 1, 8, 32], strides = [1, 1, 1, 1]} : vector<2x2x8x32xf32> to vector<1x1x8x32xf32>
    %243 = vector.shape_cast %242 : vector<1x1x8x32xf32> to vector<8x32xf32>
    %244 = vector.shape_cast %243 : vector<8x32xf32> to vector<1x8x32xf32>
    %245 = vector.extract_strided_slice %240 {offsets = [0, 0, 0, 0], sizes = [2, 1, 8, 32], strides = [1, 1, 1, 1]} : vector<2x2x8x32xf32> to vector<2x1x8x32xf32>
    %246 = vector.shape_cast %245 : vector<2x1x8x32xf32> to vector<2x8x32xf32>
    %247 = vector.broadcast %244 : vector<1x8x32xf32> to vector<2x8x32xf32>
    %248 = arith.mulf %247, %246 : vector<2x8x32xf32>
    %249 = vector.extract_strided_slice %241 {offsets = [0, 1, 0, 0], sizes = [1, 1, 8, 32], strides = [1, 1, 1, 1]} : vector<2x2x8x32xf32> to vector<1x1x8x32xf32>
    %250 = vector.shape_cast %249 : vector<1x1x8x32xf32> to vector<8x32xf32>
    %251 = vector.shape_cast %250 : vector<8x32xf32> to vector<1x8x32xf32>
    %252 = vector.extract_strided_slice %240 {offsets = [0, 1, 0, 0], sizes = [2, 1, 8, 32], strides = [1, 1, 1, 1]} : vector<2x2x8x32xf32> to vector<2x1x8x32xf32>
    %253 = vector.shape_cast %252 : vector<2x1x8x32xf32> to vector<2x8x32xf32>
    %254 = vector.broadcast %251 : vector<1x8x32xf32> to vector<2x8x32xf32>
    %255 = arith.mulf %254, %253 : vector<2x8x32xf32>
    %256 = arith.addf %248, %255 : vector<2x8x32xf32>
    %257 = vector.shape_cast %256 : vector<2x8x32xf32> to vector<2x1x8x32xf32>
    %258 = vector.extract_strided_slice %241 {offsets = [1, 0, 0, 0], sizes = [1, 1, 8, 32], strides = [1, 1, 1, 1]} : vector<2x2x8x32xf32> to vector<1x1x8x32xf32>
    %259 = vector.shape_cast %258 : vector<1x1x8x32xf32> to vector<8x32xf32>
    %260 = vector.shape_cast %259 : vector<8x32xf32> to vector<1x8x32xf32>
    %261 = vector.extract_strided_slice %240 {offsets = [0, 0, 0, 0], sizes = [2, 1, 8, 32], strides = [1, 1, 1, 1]} : vector<2x2x8x32xf32> to vector<2x1x8x32xf32>
    %262 = vector.shape_cast %261 : vector<2x1x8x32xf32> to vector<2x8x32xf32>
    %263 = vector.broadcast %260 : vector<1x8x32xf32> to vector<2x8x32xf32>
    %264 = arith.mulf %263, %262 : vector<2x8x32xf32>
    %265 = vector.extract_strided_slice %241 {offsets = [1, 1, 0, 0], sizes = [1, 1, 8, 32], strides = [1, 1, 1, 1]} : vector<2x2x8x32xf32> to vector<1x1x8x32xf32>
    %266 = vector.shape_cast %265 : vector<1x1x8x32xf32> to vector<8x32xf32>
    %267 = vector.shape_cast %266 : vector<8x32xf32> to vector<1x8x32xf32>
    %268 = vector.extract_strided_slice %240 {offsets = [0, 1, 0, 0], sizes = [2, 1, 8, 32], strides = [1, 1, 1, 1]} : vector<2x2x8x32xf32> to vector<2x1x8x32xf32>
    %269 = vector.shape_cast %268 : vector<2x1x8x32xf32> to vector<2x8x32xf32>
    %270 = vector.broadcast %267 : vector<1x8x32xf32> to vector<2x8x32xf32>
    %271 = arith.mulf %270, %269 : vector<2x8x32xf32>
    %272 = arith.addf %264, %271 : vector<2x8x32xf32>
    %273 = vector.shape_cast %272 : vector<2x8x32xf32> to vector<2x1x8x32xf32>
    %274 = tpu.concatenate %257, %273 in 1 : vector<2x1x8x32xf32>, vector<2x1x8x32xf32> -> vector<2x2x8x32xf32>
    %275 = vector.shape_cast %274 : vector<2x2x8x32xf32> to vector<32x32xf32>
    %c32 = arith.constant 32 : index
    %c0_85 = arith.constant 0 : index
    %276 = vector.load %arg4[%c32, %c0_85] : memref<64x32xf32, #tpu.memory_space<vmem>>, vector<32x32xf32>
    %cst_86 = arith.constant dense<0.000000e+00> : vector<32x32xf32>
    %277 = tpu.matmul %275, %276, %cst_86 {dimension_numbers = #tpu.dot_dimension_numbers<[1], [0], [0], [1], [0, 0, 1, 1], [], []>} : vector<32x32xf32>, vector<32x32xf32>, vector<32x32xf32> -> vector<32x32xf32>
    %278 = arith.addf %221, %277 : vector<32x32xf32>
    %c4 = arith.constant 4 : index
    %c0_87 = arith.constant 0 : index
    %279 = vector.load %arg7[%c4, %c0_87] : memref<8x128xf32, #tpu.memory_space<vmem>>, vector<1x32xf32>
    %280 = vector.broadcast %279 : vector<1x32xf32> to vector<32x32xf32>
    %281 = arith.addf %278, %280 : vector<32x32xf32>
    %cst_88 = arith.constant dense<0.000000e+00> : vector<32xf32>
    %282 = vector.multi_reduction <add>, %281, %cst_88 [1] : vector<32x32xf32> to vector<32xf32>
    %283 = vector.shape_cast %282 : vector<32xf32> to vector<32x1xf32>
    %cst_89 = arith.constant 3.200000e+01 : f32
    %284 = vector.broadcast %cst_89 : f32 to vector<32x1xf32>
    %285 = arith.divf %283, %284 : vector<32x1xf32>
    %286 = vector.broadcast %285 : vector<32x1xf32> to vector<32x32xf32>
    %287 = arith.subf %281, %286 : vector<32x32xf32>
    %288 = arith.mulf %287, %287 : vector<32x32xf32>
    %cst_90 = arith.constant dense<0.000000e+00> : vector<32xf32>
    %289 = vector.multi_reduction <add>, %288, %cst_90 [1] : vector<32x32xf32> to vector<32xf32>
    %290 = vector.shape_cast %289 : vector<32xf32> to vector<32x1xf32>
    %cst_91 = arith.constant 3.200000e+01 : f32
    %291 = vector.broadcast %cst_91 : f32 to vector<32x1xf32>
    %292 = arith.divf %290, %291 : vector<32x1xf32>
    %293 = vector.broadcast %285 : vector<32x1xf32> to vector<32x32xf32>
    %294 = arith.subf %281, %293 : vector<32x32xf32>
    %cst_92 = arith.constant 9.99999997E-7 : f32
    %295 = vector.broadcast %cst_92 : f32 to vector<32x1xf32>
    %296 = arith.addf %292, %295 : vector<32x1xf32>
    %297 = math.rsqrt %296 : vector<32x1xf32>
    %298 = vector.broadcast %297 : vector<32x1xf32> to vector<32x32xf32>
    %299 = arith.mulf %294, %298 : vector<32x32xf32>
    %c0_93 = arith.constant 0 : index
    %c128 = arith.constant 128 : index
    %300 = vector.load %arg5[%c0_93, %c128] : memref<32x256xf32, #tpu.memory_space<vmem>>, vector<32x128xf32>
    %c128_94 = arith.constant 128 : index
    %c0_95 = arith.constant 0 : index
    %301 = vector.load %arg6[%c128_94, %c0_95] : memref<256x32xf32, #tpu.memory_space<vmem>>, vector<128x32xf32>
    %cst_96 = arith.constant dense<0.000000e+00> : vector<32x128xf32>
    %302 = tpu.matmul %299, %300, %cst_96 {dimension_numbers = #tpu.dot_dimension_numbers<[1], [0], [0], [1], [0, 0, 1, 1], [], []>} : vector<32x32xf32>, vector<32x128xf32>, vector<32x128xf32> -> vector<32x128xf32>
    %c5 = arith.constant 5 : index
    %c0_97 = arith.constant 0 : index
    %303 = vector.load %arg7[%c5, %c0_97] : memref<8x128xf32, #tpu.memory_space<vmem>>, vector<1x128xf32>
    %304 = vector.broadcast %303 : vector<1x128xf32> to vector<32x128xf32>
    %305 = arith.addf %302, %304 : vector<32x128xf32>
    %cst_98 = arith.constant 5.000000e-01 : f32
    %306 = vector.broadcast %cst_98 : f32 to vector<32x128xf32>
    %307 = arith.mulf %306, %305 : vector<32x128xf32>
    %cst_99 = arith.constant 0.707106769 : f32
    %308 = vector.broadcast %cst_99 : f32 to vector<32x128xf32>
    %309 = arith.mulf %305, %308 : vector<32x128xf32>
    %cst_100 = arith.constant 0.000000e+00 : f32
    %310 = vector.broadcast %cst_100 : f32 to vector<32x128xf32>
    %311 = arith.cmpf oge, %309, %310 : vector<32x128xf32>
    %cst_101 = arith.constant 1.000000e+00 : f32
    %cst_102 = arith.constant -1.000000e+00 : f32
    %312 = vector.broadcast %cst_101 : f32 to vector<32x128xf32>
    %313 = vector.broadcast %cst_102 : f32 to vector<32x128xf32>
    %314 = arith.select %311, %312, %313 : vector<32x128xi1>, vector<32x128xf32>
    %315 = math.absf %309 : vector<32x128xf32>
    %cst_103 = arith.constant 0.327591091 : f32
    %316 = vector.broadcast %cst_103 : f32 to vector<32x128xf32>
    %317 = arith.mulf %316, %315 : vector<32x128xf32>
    %cst_104 = arith.constant 1.000000e+00 : f32
    %318 = vector.broadcast %cst_104 : f32 to vector<32x128xf32>
    %319 = arith.addf %318, %317 : vector<32x128xf32>
    %cst_105 = arith.constant 1.000000e+00 : f32
    %320 = vector.broadcast %cst_105 : f32 to vector<32x128xf32>
    %321 = arith.divf %320, %319 : vector<32x128xf32>
    %cst_106 = arith.constant 1.06140542 : f32
    %322 = vector.broadcast %cst_106 : f32 to vector<32x128xf32>
    %323 = arith.mulf %322, %321 : vector<32x128xf32>
    %cst_107 = arith.constant -1.45315206 : f32
    %324 = vector.broadcast %cst_107 : f32 to vector<32x128xf32>
    %325 = arith.addf %323, %324 : vector<32x128xf32>
    %326 = arith.mulf %325, %321 : vector<32x128xf32>
    %cst_108 = arith.constant 1.42141378 : f32
    %327 = vector.broadcast %cst_108 : f32 to vector<32x128xf32>
    %328 = arith.addf %326, %327 : vector<32x128xf32>
    %329 = arith.mulf %328, %321 : vector<32x128xf32>
    %cst_109 = arith.constant -0.284496725 : f32
    %330 = vector.broadcast %cst_109 : f32 to vector<32x128xf32>
    %331 = arith.addf %329, %330 : vector<32x128xf32>
    %332 = arith.mulf %331, %321 : vector<32x128xf32>
    %cst_110 = arith.constant 0.254829586 : f32
    %333 = vector.broadcast %cst_110 : f32 to vector<32x128xf32>
    %334 = arith.addf %332, %333 : vector<32x128xf32>
    %335 = arith.mulf %334, %321 : vector<32x128xf32>
    %cst_111 = arith.constant 0.000000e+00 : f32
    %336 = vector.broadcast %cst_111 : f32 to vector<32x128xf32>
    %337 = arith.subf %336, %315 : vector<32x128xf32>
    %338 = arith.mulf %337, %315 : vector<32x128xf32>
    %339 = math.exp %338 : vector<32x128xf32>
    %340 = arith.mulf %335, %339 : vector<32x128xf32>
    %cst_112 = arith.constant 1.000000e+00 : f32
    %341 = vector.broadcast %cst_112 : f32 to vector<32x128xf32>
    %342 = arith.subf %341, %340 : vector<32x128xf32>
    %343 = arith.mulf %314, %342 : vector<32x128xf32>
    %cst_113 = arith.constant 1.000000e+00 : f32
    %344 = vector.broadcast %cst_113 : f32 to vector<32x128xf32>
    %345 = arith.addf %344, %343 : vector<32x128xf32>
    %346 = arith.mulf %307, %345 : vector<32x128xf32>
    %cst_114 = arith.constant dense<0.000000e+00> : vector<32x32xf32>
    %347 = tpu.matmul %346, %301, %cst_114 {dimension_numbers = #tpu.dot_dimension_numbers<[1], [0], [0], [1], [0, 0, 1, 1], [], []>} : vector<32x128xf32>, vector<128x32xf32>, vector<32x32xf32> -> vector<32x32xf32>
    %c6 = arith.constant 6 : index
    %c0_115 = arith.constant 0 : index
    %348 = vector.load %arg7[%c6, %c0_115] : memref<8x128xf32, #tpu.memory_space<vmem>>, vector<1x32xf32>
    %349 = vector.broadcast %348 : vector<1x32xf32> to vector<32x32xf32>
    %350 = arith.addf %347, %349 : vector<32x32xf32>
    %351 = arith.addf %281, %350 : vector<32x32xf32>
    %352 = vector.shape_cast %351 : vector<32x32xf32> to vector<2x16x32xf32>
    %c0_116 = arith.constant 0 : index
    %c0_117 = arith.constant 0 : index
    %c0_118 = arith.constant 0 : index
    %353 = vector.load %arg8[%c0_116, %c0_117, %c0_118] : memref<2x16x32xf32, #tpu.memory_space<vmem>>, vector<2x16x32xf32>
    tpu.vector_store %arg8[%c0_116, %c0_117, %c0_118], %352 {strides = array<i32>} : memref<2x16x32xf32, #tpu.memory_space<vmem>>, vector<2x16x32xf32>,
    return
  }
  func.func @transform_0(%arg0: i32) -> (i32, i32, i32) {
    %c0_i32 = arith.constant 0 : i32
    %c0_i32_0 = arith.constant 0 : i32
    %c0_i32_1 = arith.constant 0 : i32
    return %arg0, %c0_i32, %c0_i32_0 : i32, i32, i32
  }
  func.func @transform_1(%arg0: i32) -> (i32, i32, i32, i32) {
    %c0_i32 = arith.constant 0 : i32
    %c0_i32_0 = arith.constant 0 : i32
    %c0_i32_1 = arith.constant 0 : i32
    %c0_i32_2 = arith.constant 0 : i32
    %c0_i32_3 = arith.constant 0 : i32
    return %c0_i32, %c0_i32_0, %c0_i32_1, %c0_i32_2 : i32, i32, i32, i32
  }
  func.func @transform_2(%arg0: i32) -> (i32, i32) {
    %c0_i32 = arith.constant 0 : i32
    %c0_i32_0 = arith.constant 0 : i32
    %c0_i32_1 = arith.constant 0 : i32
    return %c0_i32, %c0_i32_0 : i32, i32
  }
  func.func @transform_3(%arg0: i32) -> (i32, i32) {
    %c0_i32 = arith.constant 0 : i32
    %c0_i32_0 = arith.constant 0 : i32
    %c0_i32_1 = arith.constant 0 : i32
    return %c0_i32, %c0_i32_0 : i32, i32
  }
  func.func @transform_4(%arg0: i32) -> (i32, i32) {
    %c0_i32 = arith.constant 0 : i32
    %c0_i32_0 = arith.constant 0 : i32
    %c0_i32_1 = arith.constant 0 : i32
    return %c0_i32, %c0_i32_0 : i32, i32
  }
  func.func @transform_5(%arg0: i32) -> (i32, i32) {
    %c0_i32 = arith.constant 0 : i32
    %c0_i32_0 = arith.constant 0 : i32
    %c0_i32_1 = arith.constant 0 : i32
    return %c0_i32, %c0_i32_0 : i32, i32
  }
  func.func @transform_6(%arg0: i32) -> (i32, i32) {
    %c0_i32 = arith.constant 0 : i32
    %c0_i32_0 = arith.constant 0 : i32
    %c0_i32_1 = arith.constant 0 : i32
    return %c0_i32, %c0_i32_0 : i32, i32
  }
  func.func @transform_7(%arg0: i32) -> (i32, i32, i32) {
    %c0_i32 = arith.constant 0 : i32
    %c0_i32_0 = arith.constant 0 : i32
    %c0_i32_1 = arith.constant 0 : i32
    return %arg0, %c0_i32, %c0_i32_0 : i32, i32, i32
  }
}

</mosaic_0001>

<bundles_post_ra>
// kernel: tpu_custom_call.1
= control target key start
LH: loop header
LB: loop body
LE: loop exit
PB: predicated region body
PF: predicated region fallthrough
CT: control target
= control target key end

     0   :  { %12 = vsyncpa [#allocation3], 0  ;;  %s6021_s0 = inlined_call_operand.vmem [shape: f32[4,16,32], index: 0, kind: input, shape index: {}]   ;;  %s6022_s1 = inlined_call_operand.vmem [shape: f32[2,2,8,32], index: 1, kind: input, shape index: {}]   ;;  %s6023_s2 = inlined_call_operand.vmem [shape: f32[32,96], index: 2, kind: input, shape index: {}]   ;;  %s6024_s3 = inlined_call_operand.vmem [shape: f32[64,32], index: 3, kind: input, shape index: {}]   ;;  %s6025_s4 = inlined_call_operand.vmem [shape: f32[32,256], index: 4, kind: input, shape index: {}]   ;;  %s6026_s5 = inlined_call_operand.vmem [shape: f32[256,32], index: 5, kind: input, shape index: {}]   ;;  %s6027_s6 = inlined_call_operand.vmem [shape: f32[8,128], index: 6, kind: input, shape index: {}]   ;;  %s6028_s7 = inlined_call_operand.hbm [shape: f32[4,16,32], index: 7, kind: output, shape index: {}]  }
   0x1   :  { %14 = vsyncpa [#allocation3 + $0x1], 0  ;;  %s5175_s24 = smov 0   ;;  %s5177_s25 = smov 0  }
   0x2   :  { %s5179_s26 = smov 0   ;;  %s5181_s27 = smov 0  }
   0x3 LB: > { %s5196_s28 = sadd.s32 4294967295, %s5125_s27   ;;  %s4199_s29 = sadd.s32 4294967294, %s5125_s27   ;;  %s5125_s27 = sphi %s5181_s27, %s6040_s27   ;;  %s5121_s26 = sphi %s5179_s26, %s6039_s26   ;;  %s5117_s25 = sphi %s5177_s25, %s6038_s25   ;;  %s5113_s24 = sphi %s5175_s24, %s6037_s24  }
   0x4   : > { %s5200_s30 = sadd.s32 1, %s5125_s27   ;;  %s179_s8 = sadd.s32 1, %s5121_s26 }
   0x5   : > { %s176_s9 = ssub.s32 %s5125_s27, %s5200_s30  ;;  %p189_p0 = scmp.ne.s32.totalorder %s5121_s26, %s5117_s25 }
   0x6   : > { %p177_p1 = scmp.eq.s32.totalorder %s176_s9, 0  ;;  %p190_p2 = scmp.eq.s32.totalorder %s5196_s28, 1 }
   0x7   : > { %p195_p3 = scmp.ne.s32.totalorder %s5117_s25, %s5113_s24  ;;  %p196_p4 = scmp.eq.s32.totalorder %s4199_s29, 1 }
   0x8   : > { %s5211_s10 = scalar_select %p177_p1, %s5121_s26, %s179_s8  }
   0x9   : > { %p5213_p5 = por %p190_p2, %p189_p0  ;;  %p5217_p6 = por %p196_p4, %p195_p3 }
   0xa   : > { %p4202_p7 = scmp.ge.s32.totalorder %s5125_s27, 1  ;;  %p242_p8 = scmp.lt.s32.totalorder %s5125_s27, 3 }
   0xc   : > { %p243_p9 = pnand %p4202_p7, %p242_p8 }
   0xd   : > { %s4204_s13 = sshll.u32 (!%p243_p9), %s5196_s28, 1  ;;  %vm287_vm0 = vcmask (!%p243_p9), 261120   ;;  %v341_v28 = vld [vmem:[%s6023_s2] sm:$0xff] (!%p243_p9)  ;;  %v342_v29 = vld [vmem:[%s6023_s2 + $0x8] sm:$0xff] (!%p243_p9)  ;;  %v343_v31 = vld [vmem:[%s6023_s2 + $0x10] sm:$0xff] (!%p243_p9)  ;;  %v5127_v54 = vmov (!%p243_p9), 0.0  }
   0xe   : > { %246 = sbr.rel (%p243_p9) target bundleno = 4881 (0x1311), region = 48  ;;  %p276_p10 = scmp.lt.s32.totalorder (!%p243_p9), %s4204_s13, 3  ;;  %v4757_v30 = vpack.c.bf16 (!%p243_p9), %v342_v29, %v341_v28  ;;  %v344_v32 = vld [vmem:[%s6023_s2 + $0x18] sm:$0xff] (!%p243_p9)  ;;  %4480 = vmatprep.subr.mxu0 (!%p243_p9), %v5127_v54  ;;  %vm5128_vm1 = vmmov (!%p243_p9), 0   ;;  %v4207_v55 = vld [vmem:[%s6027_s6] ss:$0 sm:$0xff] (!%p243_p9) }
   0xf   : > { %v4761_v33 = vpack.c.bf16 (!%p243_p9), %v344_v32, %v343_v31  ;;  %4482 = vmatprep.mubr.msk.f32.mxu0 (!%p243_p9), %vm5128_vm1, %v5127_v54  ;;  %vm774_vm6 = vcmask (!%p243_p9), 64512   ;;  %s5130_s15 = smov (!%p243_p9), 64   ;;  %s272_s19 = sand.u32 (!%p243_p9), 1, %s5117_s25  }
  0x10   : > { %4758 = vmatprep.subr.bf16.mxu1 (!%p243_p9), %v4757_v30  ;;  %s4203_s22 = sshll.u32 (!%p243_p9), %s272_s19, 5  ;;  %s4306_s8 = sshll.u32 (!%p243_p9), %s5196_s28, 9 }
  0x11   : > { %4760 = vmatpush3.bf16.msra.mxu1 (!%p243_p9), %v4757_v30  ;;  %s274_s23 = scalar_lea.vmem (!%p243_p9), [#allocation2], %s4203_s22  ;;  %s5980_s28 = scalar_lea.sflag (!%p243_p9), [#allocation3], %s272_s19 }
  0x12   : > { %4762 = vmatprep.subr.bf16.mxu1 (!%p243_p9), %v4761_v33  ;;  %s4137_s29 = sshll.u32 (!%p243_p9), %s274_s23, 4  ;;  %s5975_s29 = int_to_ptr.vmem [resolvable:$true] %s4137_s29 }
  0x15   : > { %s6042_s13 = smov (!%p276_p10, %s4204_s13), 3  ;;  %4764 = vmatpush3.bf16.msra.mxu1 %v4761_v33 }
  0x16   : > { %s4304_s14 = sshll.u32 %s6042_s13, 4  ;;  %4465 = vmatprep.subr.mxu1 %v5127_v54  ;;  %s5973_s13 = scalar_lea.hbm %s6028_s7, %s4306_s8 }
  0x17   : > { %s5227_s17 = scalar_lea.vmem %s6021_s0, %s4304_s14  ;;  %s5129_s14 = smov 96  }
  0x18   : > { %v283_v0 = vld [vmem:[%s5227_s17] sm:$0xff]  ;;  %v285_v1 = vld [vmem:[%s5227_s17 + $0x10] sm:$0xff]  ;;  %v284_v2 = vld [vmem:[%s5227_s17 + $0x8] sm:$0xff] }
  0x19   : > { %v288_v3 = vsel %vm287_vm0, %v283_v0, 0.0  ;;  %v294_v4 = vsel %vm287_vm0, %v285_v1, 0.0  ;;  %v286_v5 = vld [vmem:[%s5227_s17 + $0x18] sm:$0xff]  ;;  %v291_v6 = vsel %vm287_vm0, %v284_v2, 0.0 }
  0x1a   : > { %289 = vadd.xlane.f32.xlu0 %v288_v3  ;;  %295 = vadd.xlane.f32.xlu1 %v294_v4  ;;  %v297_v7 = vsel %vm287_vm0, %v286_v5, 0.0 }
  0x1e   : > { %292 = vadd.xlane.f32.xlu0 %v291_v6  ;;  %298 = vadd.xlane.f32.xlu1 %v297_v7 }
  0xa7   : > { %v290_v8 = vpop.xlane.xlu0 %289  ;;  %v296_v9 = vpop.xlane.xlu1 %295 }
  0xa8   : > { %v301_v10 = vmul.f32 0.03125, %v290_v8  ;;  %v303_v11 = vmul.f32 0.03125, %v296_v9 }
  0xaa   : > { %v305_v12 = vsub.f32 %v283_v0, %v301_v10  ;;  %v307_v13 = vsub.f32 %v285_v1, %v303_v11  ;;  %v447_v0 = vlaneseq }
  0xab   : > { %v293_v14 = vpop.xlane.xlu0 %292  ;;  %v299_v15 = vpop.xlane.xlu1 %298 }
  0xac   : > { %v302_v16 = vmul.f32 0.03125, %v293_v14  ;;  %v304_v17 = vmul.f32 0.03125, %v299_v15  ;;  %v309_v18 = vmul.f32 %v305_v12, %v305_v12  ;;  %v311_v19 = vmul.f32 %v307_v13, %v307_v13 }
  0xad   : > { %v5278_v1 = vand.u32 127, %v447_v0 }
  0xae   : > { %v306_v20 = vsub.f32 %v284_v2, %v302_v16  ;;  %v308_v21 = vsub.f32 %v286_v5, %v304_v17  ;;  %v313_v22 = vsel %vm287_vm0, %v309_v18, 0.0  ;;  %v319_v23 = vsel %vm287_vm0, %v311_v19, 0.0 }
  0xaf   : > { %314 = vadd.xlane.f32.xlu0 %v313_v22  ;;  %vm450_vm2 = vcmp.lt.s32.totalorder %v5278_v1, 8  ;;  %vm835_vm3 = vcmp.ge.s32.totalorder %v5278_v1, 8  ;;  %vm836_vm4 = vcmp.lt.s32.totalorder %v5278_v1, 16  ;;  %vm1772_vm7 = vcmp.ge.s32.totalorder %v5278_v1, 16 }
  0xb0   : > { %v310_v24 = vmul.f32 %v306_v20, %v306_v20  ;;  %v312_v25 = vmul.f32 %v308_v21, %v308_v21  ;;  %vm5323_vm5 = vmand %vm835_vm3, %vm836_vm4  ;;  %vm1773_vm8 = vcmp.lt.s32.totalorder %v5278_v1, 24  ;;  %vm2421_vm10 = vcmp.ge.s32.totalorder %v5278_v1, 24 }
  0xb1   : > { %vm5458_vm9 = vmand %vm1772_vm7, %vm1773_vm8  ;;  %vm2422_vm11 = vcmp.lt.s32.totalorder %v5278_v1, 32 }
  0xb2   : > { %v316_v26 = vsel %vm287_vm0, %v310_v24, 0.0  ;;  %v322_v27 = vsel %vm287_vm0, %v312_v25, 0.0  ;;  %vm5544_vm12 = vmand %vm2421_vm10, %vm2422_vm11 }
  0xb3   : > { %320 = vadd.xlane.f32.xlu0 %v319_v23  ;;  %317 = vadd.xlane.f32.xlu1 %v316_v26 }
  0xb7   : > { %323 = vadd.xlane.f32.xlu1 %v322_v27 }
 0x13c   : > { %v315_v34 = vpop.xlane.xlu0 %314 }
 0x13d   : > { %v325_v35 = vmul.f32 0.03125, %v315_v34 }
 0x13f   : > { %v329_v36 = vadd.f32 1e-06, %v325_v35 }
 0x140   : > { %v318_v37 = vpop.xlane.xlu1 %317  ;;  %v321_v38 = vpop.xlane.xlu0 %320 }
 0x141   : > { %4931 = vrsqrt.f32 %v329_v36  ;;  %v326_v39 = vmul.f32 0.03125, %v318_v37  ;;  %v327_v40 = vmul.f32 0.03125, %v321_v38 }
 0x143   : > { %v330_v41 = vadd.f32 1e-06, %v326_v39  ;;  %v331_v42 = vadd.f32 1e-06, %v327_v40 }
 0x144   : > { %v324_v43 = vpop.xlane.xlu1 %323 }
 0x145   : > { %4933 = vrsqrt.f32 %v330_v41  ;;  %v328_v44 = vmul.f32 0.03125, %v324_v43 }
 0x146   : > { %4935 = vrsqrt.f32 %v331_v42 }
 0x147   : > { %v332_v45 = vadd.f32 1e-06, %v328_v44 }
 0x149   : > { %4937 = vrsqrt.f32 %v332_v45 }
 0x14b   : > { %v4932_v46 = vpop.eup %4931 }
 0x14c   : > { %v337_v47 = vmul.f32 %v4932_v46, %v305_v12 }
 0x14e   : > { %4459 = vmatprep.mubr.msk.f32.mxu1 %vm287_vm0, %v337_v47 }
 0x14f   : > { %v4934_v48 = vpop.eup %4933 }
 0x150   : > { %v4936_v49 = vpop.eup %4935  ;;  %v338_v50 = vmul.f32 %v4934_v48, %v306_v20 }
 0x151   : > { %v339_v51 = vmul.f32 %v4936_v49, %v307_v13 }
 0x152   : > { %4460 = vmatmul.mubr.msk.f32.vlgmr.msra.gmra.mrb[0].mxu1 %vm287_vm0, %v338_v50 }
 0x153   : > { %v4938_v52 = vpop.eup %4937  ;;  %4462 = vmatprep.mubr.msk.f32.mxu1 %vm287_vm0, %v339_v51 }
 0x154   : > { %v340_v53 = vmul.f32 %v4938_v52, %v308_v21 }
 0x156   : > { %4463 = vmatmul.mubr.msk.f32.gmra.mrb[2].mxu1 %vm287_vm0, %v340_v53 }
 0x157   : > { %4467 = vmatprep.mubr.msk.f32.mxu1 %vm5128_vm1, %v5127_v54 }
 0x225   : > { %v4461_v56 = vpop.f32.mrb[0].mxu1 }
 0x226   : > { %v5266_v57 = vadd.f32 %v4461_v56, %v4207_v55  ;;  %v428_v58 = vpop.f32.mrb[1].mxu1 }
 0x227   : > { %v5268_v59 = vadd.f32 %v4207_v55, %v428_v58 }
 0x228   : > { %537 = vrot.lane.b32.xlu1 %v5266_v57, %s5129_s14  ;;  %v455_v6 = vsel %vm450_vm2, %v5266_v57, 0.0  ;;  %v841_v12 = vsel %vm5323_vm5, %v5266_v57, 0.0 }
 0x229   : > { %459 = vrot.lane.b32.xlu0 %v5268_v59, %s5129_s14  ;;  %v4464_v60 = vpop.f32.mrb[2].mxu1  ;;  %v454_v4 = vsel %vm450_vm2, %v5268_v59, 0.0  ;;  %v840_v11 = vsel %vm5323_vm5, %v5268_v59, 0.0  ;;  %v2426_v1 = vsel %vm5544_vm12, %v5268_v59, 0.0 }
 0x22a   : > { %v438_v61 = vpop.f32.mrb[3].mxu1  ;;  %v5275_v63 = vadd.f32 %v4464_v60, %v4207_v55 }
 0x22b   : > { %v5272_v62 = vadd.f32 %v4207_v55, %v438_v61 }
 0x22c   : > { %v457_v9 = vsel %vm450_vm2, %v5275_v63, 0.0  ;;  %v843_v14 = vsel %vm5323_vm5, %v5275_v63, 0.0 }
 0x22d   : > { %615 = vrot.lane.b32.xlu1 %v5272_v62, %s5129_s14  ;;  %v456_v8 = vsel %vm450_vm2, %v5272_v62, 0.0  ;;  %v842_v13 = vsel %vm5323_vm5, %v5272_v62, 0.0 }
 0x231   : > { %693 = vrot.lane.b32.xlu1 %v5275_v63, %s5129_s14  ;;  %s5063_s14 = scalar_lea.vmem %s5975_s29, 512 }
 0x232   : > { %p5064_p11 = scmp.ne.s32.totalorder %s5975_s29, %s5063_s14 }
 0x234   : > { %p5065_p12 = pnand %p5064_p11, %p5213_p5 }
 0x236   : > { %p5066_p13 = pneg %p5065_p12 }
 0x29a   : > { %v5280_v2 = vpop.permute.xlu1 %537 }
 0x29b   : > { %v5282_v3 = vpop.permute.xlu0 %459 }
 0x29c   : > { %4466 = vmatpush3.xpose.msk.msra.mxu1 %vm287_vm0, %v5282_v3 }
 0x29d   : > { %4470 = vmatprep.subr.mxu1 %v5127_v54 }
 0x29f   : > { %v5291_v5 = vpop.permute.xlu1 %615  ;;  %4468 = vmatmul.mubr.msk.f32.vlgmr.msra.gmra.mrb[4].mxu1 %vm287_vm0, %v454_v4 }
 0x2a0   : > { %4471 = vmatpush3.xpose.msk.msra.mxu1 %vm287_vm0, %v5280_v2  ;;  %4472 = vmatprep.mubr.msk.f32.mxu1 %vm5128_vm1, %v5127_v54 }
 0x2a1   : > { %4475 = vmatprep.subr.mxu1 %v5127_v54 }
 0x2a3   : > { %v5302_v7 = vpop.permute.xlu1 %693  ;;  %4473 = vmatmul.mubr.msk.f32.vlgmr.msra.gmra.mrb[6].mxu1 %vm287_vm0, %v455_v6 }
 0x2a4   : > { %4476 = vmatpush3.xpose.msk.msra.mxu1 %vm287_vm0, %v5291_v5  ;;  %4481 = vmatpush3.xpose.msk.msra.mxu0 %vm287_vm0, %v5302_v7 }
 0x2a5   : > { %4477 = vmatprep.mubr.msk.f32.mxu1 %vm5128_vm1, %v5127_v54  ;;  %4485 = vmatprep.subr.mxu1 %v5127_v54 }
 0x2a6   : > { %4490 = vmatprep.subr.mxu0 %v5127_v54 }
 0x2a7   : > { %4478 = vmatmul.mubr.msk.f32.vlgmr.msra.gmra.mrb[8].mxu1 %vm287_vm0, %v456_v8  ;;  %4483 = vmatmul.mubr.msk.f32.vlgmr.msra.gmra.mrb[0].mxu0 %vm287_vm0, %v457_v9 }
 0x2a8   : > { %4486 = vmatpush3.xpose.msk.msra.mxu1 %vm287_vm0, %v5282_v3  ;;  %4491 = vmatpush3.xpose.msk.msra.mxu0 %vm287_vm0, %v5280_v2 }
 0x2a9   : > { %4487 = vmatprep.mubr.msk.f32.mxu1 %vm5128_vm1, %v5127_v54  ;;  %4492 = vmatprep.mubr.msk.f32.mxu0 %vm5128_vm1, %v5127_v54 }
 0x2aa   : > { %4495 = vmatprep.subr.mxu1 %v5127_v54  ;;  %4500 = vmatprep.subr.mxu0 %v5127_v54 }
 0x2ab   : > { %4488 = vmatmul.mubr.msk.f32.vlgmr.msra.gmra.mrb[10].mxu1 %vm287_vm0, %v840_v11  ;;  %4493 = vmatmul.mubr.msk.f32.vlgmr.msra.gmra.mrb[2].mxu0 %vm287_vm0, %v841_v12 }
 0x2ac   : > { %4496 = vmatpush3.xpose.msk.msra.mxu1 %vm287_vm0, %v5291_v5  ;;  %4501 = vmatpush3.xpose.msk.msra.mxu0 %vm287_vm0, %v5302_v7 }
 0x2ad   : > { %4497 = vmatprep.mubr.msk.f32.mxu1 %vm5128_vm1, %v5127_v54  ;;  %4502 = vmatprep.mubr.msk.f32.mxu0 %vm5128_vm1, %v5127_v54 }
 0x2ae   : > { %4510 = vmatprep.subr.mxu0 %v5127_v54  ;;  %4505 = vmatprep.subr.mxu1 %v5127_v54 }
 0x2af   : > { %4498 = vmatmul.mubr.msk.f32.vlgmr.msra.gmra.mrb[12].mxu1 %vm287_vm0, %v842_v13  ;;  %4503 = vmatmul.mubr.msk.f32.vlgmr.msra.gmra.mrb[4].mxu0 %vm287_vm0, %v843_v14 }
 0x2b0   : > { %4512 = vmatprep.mubr.msk.f32.mxu0 %vm5128_vm1, %v5127_v54  ;;  %4507 = vmatprep.mubr.msk.f32.mxu1 %vm5128_vm1, %v5127_v54 }
 0x372   : > { %v532_v15 = vpop.f32.mrb[4].mxu1 }
 0x373   : > { %v4469_v16 = vpop.f32.mrb[5].mxu1  ;;  %v770_v42 = vmul.f32 0.35355338, %v532_v15 }
 0x375   : > { %v775_v45 = vsel %vm774_vm6, %v770_v42, -inf }
 0x376   : > { %v610_v17 = vpop.f32.mrb[6].mxu1 }
 0x377   : > { %v4474_v18 = vpop.f32.mrb[7].mxu1  ;;  %v771_v28 = vmul.f32 0.35355338, %v610_v17 }
 0x379   : > { %v778_v38 = vsel %vm774_vm6, %v771_v28, -inf }
 0x37a   : > { %v688_v19 = vpop.f32.mrb[8].mxu1  ;;  %v766_v20 = vpop.f32.mrb[0].mxu0 }
 0x37b   : > { %v4479_v21 = vpop.f32.mrb[9].mxu1  ;;  %v4484_v22 = vpop.f32.mrb[1].mxu0  ;;  %v773_v35 = vmul.f32 0.35355338, %v766_v20  ;;  %v772_v44 = vmul.f32 0.35355338, %v688_v19 }
 0x37d   : > { %v784_v40 = vsel %vm774_vm6, %v773_v35, -inf  ;;  %v781_v46 = vsel %vm774_vm6, %v772_v44, -inf }
 0x37e   : > { %v913_v23 = vpop.f32.mrb[10].mxu1  ;;  %v986_v24 = vpop.f32.mrb[2].mxu0 }
 0x37f   : > { %v1137_v25 = vmul.f32 0.35355338, %v986_v24  ;;  %v4489_v26 = vpop.f32.mrb[11].mxu1  ;;  %v4494_v27 = vpop.f32.mrb[3].mxu0  ;;  %v1136_v36 = vmul.f32 0.35355338, %v913_v23 }
 0x381   : > { %v1143_v29 = vsel %vm774_vm6, %v1137_v25, -inf  ;;  %v1140_v41 = vsel %vm774_vm6, %v1136_v36, -inf }
 0x382   : > { %1144 = vmax.xlane.f32.xlu1 %v1143_v29  ;;  %v1059_v30 = vpop.f32.mrb[12].mxu1  ;;  %v1132_v31 = vpop.f32.mrb[4].mxu0 }
 0x383   : > { %v1139_v32 = vmul.f32 0.35355338, %v1132_v31  ;;  %v4499_v33 = vpop.f32.mrb[13].mxu1  ;;  %v4504_v34 = vpop.f32.mrb[5].mxu0  ;;  %v1138_v39 = vmul.f32 0.35355338, %v1059_v30 }
 0x385   : > { %v1149_v37 = vsel %vm774_vm6, %v1139_v32, -inf  ;;  %v1146_v43 = vsel %vm774_vm6, %v1138_v39, -inf }
 0x386   : > { %1150 = vmax.xlane.f32.xlu0 %v1149_v37  ;;  %779 = vmax.xlane.f32.xlu1 %v778_v38 }
 0x38a   : > { %785 = vmax.xlane.f32.xlu1 %v784_v40  ;;  %1141 = vmax.xlane.f32.xlu0 %v1140_v41 }
 0x38e   : > { %1147 = vmax.xlane.f32.xlu0 %v1146_v43 }
 0x392   : > { %776 = vmax.xlane.f32.xlu0 %v775_v45 }
 0x396   : > { %782 = vmax.xlane.f32.xlu0 %v781_v46 }
 0x40f   : > { %v1145_v47 = vpop.xlane.xlu1 %1144 }
 0x410   : > { %v1153_v55 = vsub.f32 %v1137_v25, %v1145_v47 }
 0x412   : > { %v1158_v61 = vmul.f32 1.442695, %v1153_v55 }
 0x413   : > { %v780_v48 = vpop.xlane.xlu1 %779  ;;  %v1151_v49 = vpop.xlane.xlu0 %1150 }
 0x414   : > { %v788_v50 = vsub.f32 %v771_v28, %v780_v48  ;;  %v1155_v0 = vsub.f32 %v1139_v32, %v1151_v49 }
 0x416   : > { %v793_v56 = vmul.f32 1.442695, %v788_v50  ;;  %v1162_v8 = vmul.f32 1.442695, %v1155_v0 }
 0x417   : > { %v786_v51 = vpop.xlane.xlu1 %785  ;;  %v1142_v52 = vpop.xlane.xlu0 %1141 }
 0x418   : > { %v790_v53 = vsub.f32 %v773_v35, %v786_v51  ;;  %v1152_v9 = vsub.f32 %v1136_v36, %v1142_v52 }
 0x41a   : > { %v797_v58 = vmul.f32 1.442695, %v790_v53  ;;  %v1156_v15 = vmul.f32 1.442695, %v1152_v9  ;;  %v1780_v9 = vsel %vm5458_vm9, %v5275_v63, 0.0 }
 0x41b   : > { %v1148_v60 = vpop.xlane.xlu0 %1147 }
 0x41c   : > { %4939 = vpow2.f32 %v797_v58  ;;  %v1154_v16 = vsub.f32 %v1138_v39, %v1148_v60 }
 0x41d   : > { %4941 = vpow2.f32 %v793_v56 }
 0x41e   : > { %4943 = vpow2.f32 %v1158_v61  ;;  %v1160_v20 = vmul.f32 1.442695, %v1154_v16 }
 0x41f   : > { %v777_v4 = vpop.xlane.xlu0 %776 }
 0x420   : > { %v787_v6 = vsub.f32 %v770_v42, %v777_v4 }
 0x422   : > { %v791_v11 = vmul.f32 1.442695, %v787_v6 }
 0x423   : > { %v783_v12 = vpop.xlane.xlu0 %782 }
 0x424   : > { %4945 = vpow2.f32 %v791_v11  ;;  %v789_v13 = vsub.f32 %v772_v44, %v783_v12  ;;  %v1777_v11 = vsel %vm5458_vm9, %v5268_v59, 0.0  ;;  %v1779_v12 = vsel %vm5458_vm9, %v5272_v62, 0.0 }
 0x425   : > { %4947 = vpow2.f32 %v1162_v8  ;;  %v1778_v8 = vsel %vm5458_vm9, %v5266_v57, 0.0 }
 0x426   : > { %v5375_v14 = vpop.eup %4939  ;;  %v795_v17 = vmul.f32 1.442695, %v789_v13 }
 0x427   : > { %v808_v18 = vsel %vm774_vm6, %v5375_v14, 0.0  ;;  %v5379_v19 = vpop.eup %4941 }
 0x428   : > { %4949 = vpow2.f32 %v795_v17  ;;  %809 = vadd.xlane.f32.xlu1 %v808_v18  ;;  %v802_v21 = vsel %vm774_vm6, %v5379_v19, 0.0  ;;  %v4944_v22 = vpop.eup %4943 }
 0x429   : > { %4951 = vpow2.f32 %v1156_v15  ;;  %v1167_v24 = vsel %vm774_vm6, %v4944_v22, 0.0 }
 0x42a   : > { %4953 = vpow2.f32 %v1160_v20 }
 0x42c   : > { %803 = vadd.xlane.f32.xlu1 %v802_v21 }
 0x42e   : > { %v5383_v23 = vpop.eup %4945 }
 0x42f   : > { %v799_v25 = vsel %vm774_vm6, %v5383_v23, 0.0  ;;  %v4948_v26 = vpop.eup %4947 }
 0x430   : > { %1168 = vadd.xlane.f32.xlu1 %v1167_v24  ;;  %800 = vadd.xlane.f32.xlu0 %v799_v25  ;;  %v1173_v28 = vsel %vm774_vm6, %v4948_v26, 0.0 }
 0x432   : > { %v5388_v27 = vpop.eup %4949 }
 0x433   : > { %v805_v29 = vsel %vm774_vm6, %v5388_v27, 0.0  ;;  %v4952_v30 = vpop.eup %4951 }
 0x434   : > { %1174 = vadd.xlane.f32.xlu1 %v1173_v28  ;;  %806 = vadd.xlane.f32.xlu0 %v805_v29  ;;  %v1164_v31 = vsel %vm774_vm6, %v4952_v30, 0.0  ;;  %v4954_v32 = vpop.eup %4953 }
 0x435   : > { %v1170_v33 = vsel %vm774_vm6, %v4954_v32, 0.0 }
 0x438   : > { %1165 = vadd.xlane.f32.xlu0 %v1164_v31 }
 0x43c   : > { %1171 = vadd.xlane.f32.xlu0 %v1170_v33 }
 0x445   : > { %821 = vrot.lane.b32.xlu1 %v5266_v57, %s5130_s15 }
 0x449   : > { %823 = vrot.lane.b32.xlu1 %v5272_v62, %s5130_s15 }
 0x44d   : > { %825 = vrot.lane.b32.xlu1 %v5275_v63, %s5130_s15 }
 0x452   : > { %819 = vrot.lane.b32.xlu0 %v5268_v59, %s5130_s15  ;;  %v2428_v59 = vsel %vm5544_vm12, %v5272_v62, 0.0  ;;  %s5132_s15 = smov [#allocation2]  }
 0x453   : > { %s5067_s16 = sshll.u32 %s5132_s15, 4  ;;  %s5068_s16 = int_to_ptr.vmem [resolvable:$false] %s5067_s16 }
 0x454   : > { %s5069_s18 = scalar_lea.vmem %s5068_s16, 1024  ;;  %p5070_p0 = scmp.lt.s32.totalorder %s5975_s29, %s5068_s16 }
 0x455   : > { %p5071_p1 = scmp.lt.s32.totalorder %s5069_s18, %s5063_s14 }
 0x457   : > { %p5072_p2 = por %p5071_p1, %p5070_p0 }
 0x459   : > { %p5073_p3 = pnand %p5072_p2, %p5066_p13 }
 0x4b5   : > { %v810_v34 = vpop.xlane.xlu1 %809 }
 0x4b9   : > { %v804_v35 = vpop.xlane.xlu1 %803 }
 0x4bd   : > { %v1169_v36 = vpop.xlane.xlu1 %1168  ;;  %v801_v37 = vpop.xlane.xlu0 %800 }
 0x4be   : > { %4955 = vrcp.f32 %v1169_v36 }
 0x4c1   : > { %v1175_v38 = vpop.xlane.xlu1 %1174  ;;  %v807_v39 = vpop.xlane.xlu0 %806 }
 0x4c2   : > { %4957 = vrcp.f32 %v1175_v38 }
 0x4c3   : > { %4959 = vrcp.f32 %v804_v35 }
 0x4c5   : > { %v5399_v40 = vpop.permute.xlu1 %821  ;;  %v1166_v41 = vpop.xlane.xlu0 %1165 }
 0x4c6   : > { %4961 = vrcp.f32 %v1166_v41  ;;  %4511 = vmatpush3.msk.msra.mxu0 %vm5323_vm5, %v5399_v40 }
 0x4c7   : > { %4520 = vmatprep.subr.mxu0 %v5127_v54  ;;  %4963 = vrcp.f32 %v810_v34 }
 0x4c8   : > { %v4956_v42 = vpop.eup %4955 }
 0x4c9   : > { %v1181_v43 = vmul.f32 %v4956_v42, %v4944_v22  ;;  %v5405_v44 = vpop.permute.xlu1 %823  ;;  %v1172_v45 = vpop.xlane.xlu0 %1171 }
 0x4ca   : > { %4965 = vrcp.f32 %v1172_v45 }
 0x4cb   : > { %4513 = vmatmul.mubr.msk.f32.vlgmr.msra.gmra.mrb[6].mxu0 %vm774_vm6, %v1181_v43  ;;  %4967 = vrcp.f32 %v801_v37 }
 0x4cc   : > { %v4958_v46 = vpop.eup %4957  ;;  %4522 = vmatprep.mubr.msk.f32.mxu0 %vm5128_vm1, %v5127_v54  ;;  %4969 = vrcp.f32 %v807_v39 }
 0x4cd   : > { %v1183_v47 = vmul.f32 %v4958_v46, %v4948_v26  ;;  %v5410_v48 = vpop.permute.xlu1 %825  ;;  %v5412_v49 = vpop.permute.xlu0 %819 }
 0x4ce   : > { %v4960_v50 = vpop.eup %4959  ;;  %4506 = vmatpush3.msk.msra.mxu1 %vm5323_vm5, %v5412_v49  ;;  %4521 = vmatpush3.msk.msra.mxu0 %vm5323_vm5, %v5410_v48 }
 0x4cf   : > { %4523 = vmatmul.mubr.msk.f32.vlgmr.msra.gmra.mrb[8].mxu0 %vm774_vm6, %v1183_v47  ;;  %4530 = vmatprep.subr.mxu0 %v5127_v54  ;;  %v816_v52 = vmul.f32 %v4960_v50, %v5379_v19 }
 0x4d0   : > { %v4962_v51 = vpop.eup %4961  ;;  %4531 = vmatpush3.msk.msra.mxu0 %vm450_vm2, %v5399_v40  ;;  %4515 = vmatprep.subr.mxu1 %v5127_v54 }
 0x4d1   : > { %v1180_v53 = vmul.f32 %v4962_v51, %v4952_v30  ;;  %4532 = vmatprep.mubr.msk.f32.mxu0 %vm5128_vm1, %v5127_v54  ;;  %4540 = vmatprep.subr.mxu0 %v5127_v54  ;;  %v4964_v55 = vpop.eup %4963 }
 0x4d2   : > { %v818_v58 = vmul.f32 %v4964_v55, %v5375_v14 }
 0x4d3   : > { %4508 = vmatmul.mubr.msk.f32.vlgmr.msra.gmra.mrb[14].mxu1 %vm774_vm6, %v1180_v53  ;;  %4533 = vmatmul.mubr.msk.f32.vlgmr.msra.gmra.mrb[6].mxu0 %vm774_vm6, %v816_v52 }
 0x4d4   : > { %v4966_v56 = vpop.eup %4965  ;;  %4516 = vmatpush3.msk.msra.mxu1 %vm5323_vm5, %v5405_v44  ;;  %4541 = vmatpush3.msk.msra.mxu0 %vm450_vm2, %v5410_v48 }
 0x4d5   : > { %v1182_v60 = vmul.f32 %v4966_v56, %v4954_v32  ;;  %4517 = vmatprep.mubr.msk.f32.mxu1 %vm5128_vm1, %v5127_v54  ;;  %4525 = vmatprep.subr.mxu1 %v5127_v54  ;;  %v4968_v61 = vpop.eup %4967 }
 0x4d6   : > { %4542 = vmatprep.mubr.msk.f32.mxu0 %vm5128_vm1, %v5127_v54  ;;  %4550 = vmatprep.subr.mxu0 %v5127_v54  ;;  %v815_v10 = vmul.f32 %v4968_v61, %v5383_v23  ;;  %v4970_v0 = vpop.eup %4969 }
 0x4d7   : > { %4518 = vmatmul.mubr.msk.f32.vlgmr.msra.gmra.mrb[16].mxu1 %vm774_vm6, %v1182_v60  ;;  %4543 = vmatmul.mubr.msk.f32.vlgmr.msra.gmra.mrb[8].mxu0 %vm774_vm6, %v818_v58  ;;  %v817_v6 = vmul.f32 %v4970_v0, %v5388_v27 }
 0x4d8   : > { %4526 = vmatpush3.msk.msra.mxu1 %vm450_vm2, %v5412_v49  ;;  %4527 = vmatprep.mubr.msk.f32.mxu1 %vm5128_vm1, %v5127_v54 }
 0x4d9   : > { %4535 = vmatprep.subr.mxu1 %v5127_v54  ;;  %4552 = vmatprep.mubr.msk.f32.mxu0 %vm5128_vm1, %v5127_v54 }
 0x4db   : > { %4551 = vmatpush3.xpose.msk.msra.mxu0 %vm287_vm0, %v5280_v2  ;;  %4528 = vmatmul.mubr.msk.f32.vlgmr.msra.gmra.mrb[14].mxu1 %vm774_vm6, %v815_v10 }
 0x4dc   : > { %4536 = vmatpush3.msk.msra.mxu1 %vm450_vm2, %v5405_v44  ;;  %4560 = vmatprep.subr.mxu0 %v5127_v54 }
 0x4dd   : > { %4537 = vmatprep.mubr.msk.f32.mxu1 %vm5128_vm1, %v5127_v54  ;;  %4545 = vmatprep.subr.mxu1 %v5127_v54 }
 0x4de   : > { %4553 = vmatmul.mubr.msk.f32.vlgmr.msra.gmra.mrb[10].mxu0 %vm287_vm0, %v1778_v8 }
 0x4df   : > { %4561 = vmatpush3.xpose.msk.msra.mxu0 %vm287_vm0, %v5302_v7  ;;  %4538 = vmatmul.mubr.msk.f32.vlgmr.msra.gmra.mrb[16].mxu1 %vm774_vm6, %v817_v6 }
 0x4e0   : > { %4562 = vmatprep.mubr.msk.f32.mxu0 %vm5128_vm1, %v5127_v54  ;;  %4570 = vmatprep.subr.mxu0 %v5127_v54 }
 0x4e1   : > { %4547 = vmatprep.mubr.msk.f32.mxu1 %vm5128_vm1, %v5127_v54 }
 0x4e2   : > { %4563 = vmatmul.mubr.msk.f32.vlgmr.msra.gmra.mrb[12].mxu0 %vm287_vm0, %v1780_v9 }
 0x4e3   : > { %4546 = vmatpush3.xpose.msk.msra.mxu1 %vm287_vm0, %v5282_v3  ;;  %4571 = vmatpush3.msk.msra.mxu0 %vm5458_vm9, %v5399_v40 }
 0x4e4   : > { %4555 = vmatprep.subr.mxu1 %v5127_v54  ;;  %4572 = vmatprep.mubr.msk.f32.mxu0 %vm5128_vm1, %v5127_v54 }
 0x4e5   : > { %4580 = vmatprep.subr.mxu0 %v5127_v54 }
 0x4e6   : > { %4548 = vmatmul.mubr.msk.f32.vlgmr.msra.gmra.mrb[18].mxu1 %vm287_vm0, %v1777_v11 }
 0x4e7   : > { %4556 = vmatpush3.xpose.msk.msra.mxu1 %vm287_vm0, %v5291_v5  ;;  %4557 = vmatprep.mubr.msk.f32.mxu1 %vm5128_vm1, %v5127_v54 }
 0x4e8   : > { %4565 = vmatprep.subr.mxu1 %v5127_v54 }
 0x4ea   : > { %4558 = vmatmul.mubr.msk.f32.vlgmr.msra.gmra.mrb[20].mxu1 %vm287_vm0, %v1779_v12 }
 0x4eb   : > { %4566 = vmatpush3.msk.msra.mxu1 %vm5458_vm9, %v5412_v49  ;;  %4567 = vmatprep.mubr.msk.f32.mxu1 %vm5128_vm1, %v5127_v54 }
 0x4ec   : > { %4575 = vmatprep.subr.mxu1 %v5127_v54 }
 0x5b1   : > { %v1923_v13 = vpop.f32.mrb[10].mxu0 }
 0x5b2   : > { %v2074_v14 = vmul.f32 0.35355338, %v1923_v13  ;;  %v4554_v15 = vpop.f32.mrb[11].mxu0 }
 0x5b4   : > { %v2080_v16 = vsel %vm774_vm6, %v2074_v14, -inf }
 0x5b5   : > { %2081 = vmax.xlane.f32.xlu1 %v2080_v16  ;;  %v2069_v17 = vpop.f32.mrb[12].mxu0 }
 0x5b6   : > { %v4564_v18 = vpop.f32.mrb[13].mxu0  ;;  %v2076_v26 = vmul.f32 0.35355338, %v2069_v17 }
 0x5b8   : > { %v2086_v28 = vsel %vm774_vm6, %v2076_v26, -inf }
 0x5b9   : > { %v1850_v19 = vpop.f32.mrb[18].mxu1 }
 0x5ba   : > { %v2073_v20 = vmul.f32 0.35355338, %v1850_v19  ;;  %v4549_v21 = vpop.f32.mrb[19].mxu1 }
 0x5bc   : > { %v2077_v22 = vsel %vm774_vm6, %v2073_v20, -inf }
 0x5bd   : > { %2078 = vmax.xlane.f32.xlu0 %v2077_v22  ;;  %v1996_v23 = vpop.f32.mrb[20].mxu1 }
 0x5be   : > { %v2075_v24 = vmul.f32 0.35355338, %v1996_v23  ;;  %v4559_v25 = vpop.f32.mrb[21].mxu1 }
 0x5c0   : > { %v2083_v27 = vsel %vm774_vm6, %v2075_v24, -inf }
 0x5c1   : > { %2084 = vmax.xlane.f32.xlu0 %v2083_v27 }
 0x5c5   : > { %2087 = vmax.xlane.f32.xlu0 %v2086_v28 }
 0x642   : > { %v2082_v29 = vpop.xlane.xlu1 %2081 }
 0x643   : > { %v2090_v30 = vsub.f32 %v2074_v14, %v2082_v29 }
 0x645   : > { %v2095_v31 = vmul.f32 1.442695, %v2090_v30 }
 0x647   : > { %4971 = vpow2.f32 %v2095_v31 }
 0x64a   : > { %v2079_v32 = vpop.xlane.xlu0 %2078 }
 0x64b   : > { %v2089_v33 = vsub.f32 %v2073_v20, %v2079_v32 }
 0x64d   : > { %v2093_v34 = vmul.f32 1.442695, %v2089_v33 }
 0x64e   : > { %v2085_v35 = vpop.xlane.xlu0 %2084 }
 0x64f   : > { %4973 = vpow2.f32 %v2093_v34  ;;  %v2091_v36 = vsub.f32 %v2075_v24, %v2085_v35 }
 0x651   : > { %v4972_v37 = vpop.eup %4971  ;;  %v2097_v38 = vmul.f32 1.442695, %v2091_v36 }
 0x652   : > { %v2088_v39 = vpop.xlane.xlu0 %2087  ;;  %v2104_v41 = vsel %vm774_vm6, %v4972_v37, 0.0 }
 0x653   : > { %4975 = vpow2.f32 %v2097_v38  ;;  %v2092_v42 = vsub.f32 %v2076_v26, %v2088_v39  ;;  %2105 = vadd.xlane.f32.xlu1 %v2104_v41 }
 0x655   : > { %v2099_v43 = vmul.f32 1.442695, %v2092_v42 }
 0x657   : > { %4977 = vpow2.f32 %v2099_v43 }
 0x659   : > { %v4974_v45 = vpop.eup %4973 }
 0x65a   : > { %v2101_v46 = vsel %vm774_vm6, %v4974_v45, 0.0 }
 0x65b   : > { %2102 = vadd.xlane.f32.xlu0 %v2101_v46 }
 0x65d   : > { %v4976_v47 = vpop.eup %4975 }
 0x65e   : > { %v2107_v50 = vsel %vm774_vm6, %v4976_v47, 0.0 }
 0x65f   : > { %2108 = vadd.xlane.f32.xlu0 %v2107_v50  ;;  %v3071_v50 = vld [vmem:[%s6024_s3 + $0x8] sm:$0xff] }
 0x661   : > { %v4978_v51 = vpop.eup %4977 }
 0x662   : > { %v2110_v52 = vsel %vm774_vm6, %v4978_v51, 0.0 }
 0x663   : > { %2111 = vadd.xlane.f32.xlu1 %v2110_v52 }
 0x6e0   : > { %v2106_v53 = vpop.xlane.xlu1 %2105 }
 0x6e1   : > { %4979 = vrcp.f32 %v2106_v53 }
 0x6e8   : > { %v2103_v55 = vpop.xlane.xlu0 %2102 }
 0x6e9   : > { %4981 = vrcp.f32 %v2103_v55 }
 0x6eb   : > { %v4980_v56 = vpop.eup %4979 }
 0x6ec   : > { %v2118_v58 = vmul.f32 %v4980_v56, %v4972_v37  ;;  %v2109_v60 = vpop.xlane.xlu0 %2108 }
 0x6ed   : > { %4983 = vrcp.f32 %v2109_v60  ;;  %v3073_v60 = vld [vmem:[%s6024_s3 + $0x18] sm:$0xff] }
 0x6ee   : > { %4573 = vmatmul.mubr.msk.f32.vlgmr.msra.gmra.mrb[6].mxu0 %vm774_vm6, %v2118_v58  ;;  %v3072_v58 = vld [vmem:[%s6024_s3 + $0x10] sm:$0xff] }
 0x6ef   : > { %4581 = vmatpush3.msk.msra.mxu0 %vm5458_vm9, %v5410_v48  ;;  %4582 = vmatprep.mubr.msk.f32.mxu0 %vm5128_vm1, %v5127_v54 }
 0x6f0   : > { %v2112_v61 = vpop.xlane.xlu1 %2111  ;;  %4590 = vmatprep.subr.mxu0 %v5127_v54 }
 0x6f1   : > { %4985 = vrcp.f32 %v2112_v61 }
 0x6f3   : > { %v4982_v10 = vpop.eup %4981 }
 0x6f4   : > { %v2117_v0 = vmul.f32 %v4982_v10, %v4974_v45 }
 0x6f6   : > { %4568 = vmatmul.mubr.msk.f32.vlgmr.msra.gmra.mrb[14].mxu1 %vm774_vm6, %v2117_v0 }
 0x6f7   : > { %v4984_v6 = vpop.eup %4983  ;;  %4576 = vmatpush3.msk.msra.mxu1 %vm5458_vm9, %v5405_v44  ;;  %4577 = vmatprep.mubr.msk.f32.mxu1 %vm5128_vm1, %v5127_v54 }
 0x6f8   : > { %v2119_v8 = vmul.f32 %v4984_v6, %v4976_v47  ;;  %4585 = vmatprep.subr.mxu1 %v5127_v54  ;;  %v3070_v47 = vld [vmem:[%s6024_s3] sm:$0xff]  ;;  %v4769_v6 = vpack.c.bf16 %v3073_v60, %v3072_v58 }
 0x6f9   : > { %v4765_v56 = vpack.c.bf16 %v3071_v50, %v3070_v47  ;;  %v3237_v47 = vld [vmem:[%s6025_s4 + $0x10] sm:$0xff]  ;;  %v3238_v50 = vld [vmem:[%s6025_s4 + $0x20] sm:$0xff] }
 0x6fa   : > { %4578 = vmatmul.mubr.msk.f32.vlgmr.msra.gmra.mrb[16].mxu1 %vm774_vm6, %v2119_v8 }
 0x6fb   : > { %v4986_v9 = vpop.eup %4985  ;;  %4587 = vmatprep.mubr.msk.f32.mxu1 %vm5128_vm1, %v5127_v54 }
 0x6fc   : > { %v2120_v11 = vmul.f32 %v4986_v9, %v4978_v51 }
 0x6fe   : > { %4586 = vmatpush3.xpose.msk.msra.mxu1 %vm287_vm0, %v5282_v3  ;;  %4583 = vmatmul.mubr.msk.f32.vlgmr.msra.gmra.mrb[8].mxu0 %vm774_vm6, %v2120_v11  ;;  %v2427_v3 = vsel %vm5544_vm12, %v5266_v57, 0.0  ;;  %v2429_v57 = vsel %vm5544_vm12, %v5275_v63, 0.0 }
 0x6ff   : > { %4591 = vmatpush3.xpose.msk.msra.mxu0 %vm287_vm0, %v5280_v2  ;;  %4595 = vmatprep.subr.mxu1 %v5127_v54 }
 0x700   : > { %4592 = vmatprep.mubr.msk.f32.mxu0 %vm5128_vm1, %v5127_v54  ;;  %4600 = vmatprep.subr.mxu0 %v5127_v54 }
 0x701   : > { %4588 = vmatmul.mubr.msk.f32.vlgmr.msra.gmra.mrb[22].mxu1 %vm287_vm0, %v2426_v1 }
 0x702   : > { %4596 = vmatpush3.xpose.msk.msra.mxu1 %vm287_vm0, %v5291_v5  ;;  %4593 = vmatmul.mubr.msk.f32.vlgmr.msra.gmra.mrb[14].mxu0 %vm287_vm0, %v2427_v3 }
 0x703   : > { %4601 = vmatpush3.xpose.msk.msra.mxu0 %vm287_vm0, %v5302_v7  ;;  %4597 = vmatprep.mubr.msk.f32.mxu1 %vm5128_vm1, %v5127_v54 }
 0x704   : > { %4605 = vmatprep.subr.mxu1 %v5127_v54  ;;  %4602 = vmatprep.mubr.msk.f32.mxu0 %vm5128_vm1, %v5127_v54 }
 0x705   : > { %4598 = vmatmul.mubr.msk.f32.vlgmr.msra.gmra.mrb[24].mxu1 %vm287_vm0, %v2428_v59  ;;  %4610 = vmatprep.subr.mxu0 %v5127_v54 }
 0x706   : > { %4606 = vmatpush3.msk.msra.mxu1 %vm5544_vm12, %v5412_v49  ;;  %4603 = vmatmul.mubr.msk.f32.vlgmr.msra.gmra.mrb[16].mxu0 %vm287_vm0, %v2429_v57  ;;  %v4280_v57 = vld [vmem:[%s6027_s6 + $0x1] ss:$0 sm:$0xff] }
 0x707   : > { %4611 = vmatpush3.msk.msra.mxu0 %vm5544_vm12, %v5399_v40  ;;  %4607 = vmatprep.mubr.msk.f32.mxu1 %vm5128_vm1, %v5127_v54 }
 0x708   : > { %4615 = vmatprep.subr.mxu1 %v5127_v54  ;;  %4612 = vmatprep.mubr.msk.f32.mxu0 %vm5128_vm1, %v5127_v54 }
 0x709   : > { %4620 = vmatprep.subr.mxu0 %v5127_v54 }
 0x7d4   : > { %v2499_v62 = vpop.f32.mrb[22].mxu1 }
 0x7d5   : > { %v2722_v63 = vmul.f32 0.35355338, %v2499_v62  ;;  %v4589_v2 = vpop.f32.mrb[23].mxu1  ;;  %v2572_v5 = vpop.f32.mrb[14].mxu0  ;;  %v5059_v62 = vld [vmem:[%s5227_s17 + $0x8] sm:$0xff] }
 0x7d6   : > { %v2723_v7 = vmul.f32 0.35355338, %v2572_v5  ;;  %v4594_v49 = vpop.f32.mrb[15].mxu0  ;;  %v5060_v5 = vld [vmem:[%s5227_s17] sm:$0xff] }
 0x7d7   : > { %v2726_v12 = vsel %vm774_vm6, %v2722_v63, -inf }
 0x7d8   : > { %2727 = vmax.xlane.f32.xlu0 %v2726_v12  ;;  %v2645_v40 = vpop.f32.mrb[24].mxu1  ;;  %v2729_v13 = vsel %vm774_vm6, %v2723_v7, -inf }
 0x7d9   : > { %v2724_v14 = vmul.f32 0.35355338, %v2645_v40  ;;  %v4599_v15 = vpop.f32.mrb[25].mxu1  ;;  %2730 = vmax.xlane.f32.xlu1 %v2729_v13  ;;  %v2718_v16 = vpop.f32.mrb[16].mxu0  ;;  %v5061_v13 = vld [vmem:[%s5227_s17 + $0x18] sm:$0xff] }
 0x7da   : > { %v2725_v17 = vmul.f32 0.35355338, %v2718_v16  ;;  %v4604_v18 = vpop.f32.mrb[17].mxu0 }
 0x7db   : > { %v2732_v19 = vsel %vm774_vm6, %v2724_v14, -inf }
 0x7dc   : > { %2733 = vmax.xlane.f32.xlu0 %v2732_v19  ;;  %v2735_v20 = vsel %vm774_vm6, %v2725_v17, -inf }
 0x7dd   : > { %2736 = vmax.xlane.f32.xlu1 %v2735_v20 }
 0x865   : > { %v2728_v21 = vpop.xlane.xlu0 %2727 }
 0x866   : > { %v2738_v22 = vsub.f32 %v2722_v63, %v2728_v21  ;;  %v2731_v23 = vpop.xlane.xlu1 %2730 }
 0x867   : > { %v2739_v24 = vsub.f32 %v2723_v7, %v2731_v23 }
 0x868   : > { %v2742_v25 = vmul.f32 1.442695, %v2738_v22 }
 0x869   : > { %v2744_v26 = vmul.f32 1.442695, %v2739_v24  ;;  %v2734_v27 = vpop.xlane.xlu0 %2733 }
 0x86a   : > { %4987 = vpow2.f32 %v2742_v25  ;;  %v2740_v28 = vsub.f32 %v2724_v14, %v2734_v27  ;;  %v2737_v29 = vpop.xlane.xlu1 %2736 }
 0x86b   : > { %4989 = vpow2.f32 %v2744_v26  ;;  %v2741_v30 = vsub.f32 %v2725_v17, %v2737_v29  ;;  %v5062_v17 = vld [vmem:[%s5227_s17 + $0x10] sm:$0xff] }
 0x86c   : > { %v2746_v31 = vmul.f32 1.442695, %v2740_v28 }
 0x86d   : > { %v2748_v32 = vmul.f32 1.442695, %v2741_v30 }
 0x86e   : > { %4991 = vpow2.f32 %v2746_v31 }
 0x86f   : > { %4993 = vpow2.f32 %v2748_v32 }
 0x874   : > { %v4988_v33 = vpop.eup %4987 }
 0x875   : > { %v4990_v34 = vpop.eup %4989  ;;  %v2750_v35 = vsel %vm774_vm6, %v4988_v33, 0.0 }
 0x876   : > { %2751 = vadd.xlane.f32.xlu0 %v2750_v35  ;;  %v2753_v36 = vsel %vm774_vm6, %v4990_v34, 0.0 }
 0x877   : > { %2754 = vadd.xlane.f32.xlu1 %v2753_v36 }
 0x878   : > { %v4992_v37 = vpop.eup %4991 }
 0x879   : > { %v4994_v38 = vpop.eup %4993  ;;  %v2756_v39 = vsel %vm774_vm6, %v4992_v37, 0.0 }
 0x87a   : > { %2757 = vadd.xlane.f32.xlu0 %v2756_v39  ;;  %v2759_v41 = vsel %vm774_vm6, %v4994_v38, 0.0 }
 0x87b   : > { %2760 = vadd.xlane.f32.xlu1 %v2759_v41 }
 0x903   : > { %v2752_v42 = vpop.xlane.xlu0 %2751 }
 0x904   : > { %4995 = vrcp.f32 %v2752_v42  ;;  %v2755_v43 = vpop.xlane.xlu1 %2754 }
 0x905   : > { %4997 = vrcp.f32 %v2755_v43 }
 0x907   : > { %v2758_v45 = vpop.xlane.xlu0 %2757 }
 0x908   : > { %4999 = vrcp.f32 %v2758_v45  ;;  %v2761_v46 = vpop.xlane.xlu1 %2760 }
 0x909   : > { %5001 = vrcp.f32 %v2761_v46  ;;  %v3236_v46 = vld [vmem:[%s6025_s4] sm:$0xff] }
 0x90e   : > { %v4996_v51 = vpop.eup %4995 }
 0x90f   : > { %v4998_v52 = vpop.eup %4997  ;;  %v2766_v53 = vmul.f32 %v4996_v51, %v4988_v33  ;;  %v4773_v51 = vpack.c.bf16 %v3237_v47, %v3236_v46 }
 0x910   : > { %v2767_v55 = vmul.f32 %v4998_v52, %v4990_v34  ;;  %v3239_v52 = vld [vmem:[%s6025_s4 + $0x30] sm:$0xff] }
 0x911   : > { %4608 = vmatmul.mubr.msk.f32.vlgmr.msra.gmra.mrb[14].mxu1 %vm774_vm6, %v2766_v53  ;;  %v4777_v53 = vpack.c.bf16 %v3239_v52, %v3238_v50 }
 0x912   : > { %v5000_v61 = vpop.eup %4999  ;;  %4616 = vmatpush3.msk.msra.mxu1 %vm5544_vm12, %v5405_v44  ;;  %4613 = vmatmul.mubr.msk.f32.vlgmr.msra.gmra.mrb[6].mxu0 %vm774_vm6, %v2767_v55 }
 0x913   : > { %v5002_v10 = vpop.eup %5001  ;;  %v2768_v0 = vmul.f32 %v5000_v61, %v4992_v37  ;;  %4621 = vmatpush3.msk.msra.mxu0 %vm5544_vm12, %v5410_v48  ;;  %4617 = vmatprep.mubr.msk.f32.mxu1 %vm5128_vm1, %v5127_v54 }
 0x914   : > { %v2769_v8 = vmul.f32 %v5002_v10, %v4994_v38  ;;  %4622 = vmatprep.mubr.msk.f32.mxu0 %vm5128_vm1, %v5127_v54  ;;  %4766 = vmatprep.subr.bf16.mxu1 %v4765_v56 }
 0x915   : > { %4618 = vmatmul.mubr.msk.f32.vlgmr.msra.gmra.mrb[16].mxu1 %vm774_vm6, %v2768_v0  ;;  %4774 = vmatprep.subr.bf16.mxu0 %v4773_v51 }
 0x916   : > { %4623 = vmatmul.mubr.msk.f32.vlgmr.msra.gmra.mrb[8].mxu0 %vm774_vm6, %v2769_v8  ;;  %4768 = vmatpush3.bf16.msra.mxu1 %v4765_v56 }
 0x917   : > { %4770 = vmatprep.subr.bf16.mxu1 %v4769_v6  ;;  %4776 = vmatpush3.bf16.msra.mxu0 %v4773_v51 }
 0x918   : > { %4778 = vmatprep.subr.bf16.mxu0 %v4777_v53 }
 0x91a   : > { %4772 = vmatpush3.bf16.msra.mxu1 %v4769_v6 }
 0x91b   : > { %4780 = vmatpush3.bf16.msra.mxu0 %v4777_v53 }
 0x9e4   : > { %v2843_v44 = vpop.f32.mrb[14].mxu1 }
 0x9e5   : > { %v4609_v9 = vpop.f32.mrb[15].mxu1  ;;  %4633 = vmatprep.mubr.msk.f32.mxu1 %vm287_vm0, %v2843_v44  ;;  %v2916_v48 = vpop.f32.mrb[6].mxu0 }
 0x9e6   : > { %v4614_v11 = vpop.f32.mrb[7].mxu0  ;;  %4634 = vmatmul.mubr.msk.f32.vlgmr.msra.gmra.mrb[26].mxu1 %vm287_vm0, %v2916_v48 }
 0x9e8   : > { %v2989_v4 = vpop.f32.mrb[16].mxu1 }
 0x9e9   : > { %v4619_v54 = vpop.f32.mrb[17].mxu1  ;;  %4636 = vmatprep.mubr.msk.f32.mxu1 %vm287_vm0, %v2989_v4  ;;  %v3062_v1 = vpop.f32.mrb[8].mxu0 }
 0x9ea   : > { %v4624_v3 = vpop.f32.mrb[9].mxu0  ;;  %4637 = vmatmul.mubr.msk.f32.gmra.mrb[28].mxu1 %vm287_vm0, %v3062_v1 }
 0xab9   : > { %v4635_v59 = vpop.f32.mrb[26].mxu1 }
 0xaba   : > { %v3172_v63 = vadd.f32 %v5059_v62, %v4635_v59  ;;  %v3152_v2 = vpop.f32.mrb[27].mxu1 }
 0xabb   : > { %v3171_v7 = vadd.f32 %v5060_v5, %v3152_v2  ;;  %v3241_v2 = vld [vmem:[%s6026_s5 + $0x8] sm:$0xff] }
 0xabc   : > { %v5638_v49 = vadd.f32 %v4280_v57, %v3172_v63  ;;  %v3240_v63 = vld [vmem:[%s6026_s5] sm:$0xff] }
 0xabd   : > { %v5640_v12 = vadd.f32 %v4280_v57, %v3171_v7  ;;  %v4638_v40 = vpop.f32.mrb[28].mxu1  ;;  %v4781_v5 = vpack.c.bf16 %v3241_v2, %v3240_v63  ;;  %v3242_v7 = vld [vmem:[%s6026_s5 + $0x10] sm:$0xff] }
 0xabe   : > { %v3174_v14 = vadd.f32 %v5061_v13, %v4638_v40  ;;  %v3162_v15 = vpop.f32.mrb[29].mxu1  ;;  %v3187_v16 = vsel %vm287_vm0, %v5638_v49, 0.0  ;;  %v3243_v40 = vld [vmem:[%s6026_s5 + $0x18] sm:$0xff] }
 0xabf   : > { %v3173_v18 = vadd.f32 %v5062_v17, %v3162_v15  ;;  %3188 = vadd.xlane.f32.xlu1 %v3187_v16  ;;  %v3184_v19 = vsel %vm287_vm0, %v5640_v12, 0.0  ;;  %4782 = vmatprep.subr.bf16.mxu1 %v4781_v5  ;;  %v4785_v13 = vpack.c.bf16 %v3243_v40, %v3242_v7  ;;  %v3245_v15 = vld [vmem:[%s6026_s5 + $0x28] sm:$0xff]  ;;  %v3246_v17 = vld [vmem:[%s6026_s5 + $0x30] sm:$0xff] }
 0xac0   : > { %v5648_v20 = vadd.f32 %v4280_v57, %v3174_v14  ;;  %3185 = vadd.xlane.f32.xlu0 %v3184_v19  ;;  %4784 = vmatpush3.bf16.msra.mxu1 %v4781_v5  ;;  %v3244_v14 = vld [vmem:[%s6026_s5 + $0x20] sm:$0xff] }
 0xac1   : > { %v5650_v21 = vadd.f32 %v4280_v57, %v3173_v18  ;;  %4786 = vmatprep.subr.bf16.mxu1 %v4785_v13  ;;  %v4789_v16 = vpack.c.bf16 %v3245_v15, %v3244_v14  ;;  %v3247_v18 = vld [vmem:[%s6026_s5 + $0x38] sm:$0xff] }
 0xac2   : > { %v3193_v22 = vsel %vm287_vm0, %v5648_v20, 0.0  ;;  %v4793_v19 = vpack.c.bf16 %v3247_v18, %v3246_v17 }
 0xac3   : > { %3194 = vadd.xlane.f32.xlu1 %v3193_v22  ;;  %v3190_v23 = vsel %vm287_vm0, %v5650_v21, 0.0  ;;  %v3248_v22 = vld [vmem:[%s6026_s5 + $0x40] sm:$0xff] }
 0xac4   : > { %3191 = vadd.xlane.f32.xlu0 %v3190_v23  ;;  %4788 = vmatpush3.bf16.msra.mxu1 %v4785_v13  ;;  %v3249_v23 = vld [vmem:[%s6026_s5 + $0x48] sm:$0xff] }
 0xac5   : > { %4790 = vmatprep.subr.bf16.mxu1 %v4789_v16 }
 0xac8   : > { %4792 = vmatpush3.bf16.msra.mxu1 %v4789_v16 }
 0xac9   : > { %4794 = vmatprep.subr.bf16.mxu1 %v4793_v19 }
 0xacc   : > { %4796 = vmatpush3.bf16.msra.mxu1 %v4793_v19 }
 0xb4c   : > { %v3189_v24 = vpop.xlane.xlu1 %3188 }
 0xb4d   : > { %v3197_v25 = vmul.f32 0.03125, %v3189_v24  ;;  %v3186_v26 = vpop.xlane.xlu0 %3185  ;;  %v4797_v24 = vpack.c.bf16 %v3249_v23, %v3248_v22 }
 0xb4e   : > { %v3196_v27 = vmul.f32 0.03125, %v3186_v26  ;;  %v3251_v26 = vld [vmem:[%s6026_s5 + $0x58] sm:$0xff] }
 0xb4f   : > { %v3201_v28 = vsub.f32 %v5638_v49, %v3197_v25  ;;  %4798 = vmatprep.subr.bf16.mxu1 %v4797_v24  ;;  %v3250_v25 = vld [vmem:[%s6026_s5 + $0x50] sm:$0xff] }
 0xb50   : > { %v3200_v29 = vsub.f32 %v5640_v12, %v3196_v27  ;;  %v3195_v30 = vpop.xlane.xlu1 %3194  ;;  %4800 = vmatpush3.bf16.msra.mxu1 %v4797_v24  ;;  %v4801_v27 = vpack.c.bf16 %v3251_v26, %v3250_v25 }
 0xb51   : > { %v3199_v31 = vmul.f32 0.03125, %v3195_v30  ;;  %v3192_v32 = vpop.xlane.xlu0 %3191  ;;  %v3205_v33 = vmul.f32 %v3201_v28, %v3201_v28 }
 0xb52   : > { %v3198_v34 = vmul.f32 0.03125, %v3192_v32  ;;  %v3204_v35 = vmul.f32 %v3200_v29, %v3200_v29  ;;  %4802 = vmatprep.subr.bf16.mxu1 %v4801_v27  ;;  %v3255_v32 = vld [vmem:[%s6026_s5 + $0x78] sm:$0xff] }
 0xb53   : > { %v3203_v36 = vsub.f32 %v5648_v20, %v3199_v31  ;;  %v3211_v37 = vsel %vm287_vm0, %v3205_v33, 0.0  ;;  %v3254_v31 = vld [vmem:[%s6026_s5 + $0x70] sm:$0xff] }
 0xb54   : > { %v3202_v38 = vsub.f32 %v5650_v21, %v3198_v34  ;;  %3212 = vadd.xlane.f32.xlu1 %v3211_v37  ;;  %v3208_v39 = vsel %vm287_vm0, %v3204_v35, 0.0  ;;  %4804 = vmatpush3.bf16.msra.mxu1 %v4801_v27  ;;  %v4809_v33 = vpack.c.bf16 %v3255_v32, %v3254_v31  ;;  %v4281_v34 = vld [vmem:[%s6027_s6 + $0x2] ss:$0 sm:$0xff] }
 0xb55   : > { %3209 = vadd.xlane.f32.xlu0 %v3208_v39  ;;  %v3207_v41 = vmul.f32 %v3203_v36, %v3203_v36 }
 0xb56   : > { %v3206_v42 = vmul.f32 %v3202_v38, %v3202_v38 }
 0xb57   : > { %v3217_v43 = vsel %vm287_vm0, %v3207_v41, 0.0 }
 0xb58   : > { %3218 = vadd.xlane.f32.xlu1 %v3217_v43  ;;  %v3214_v45 = vsel %vm287_vm0, %v3206_v42, 0.0 }
 0xb59   : > { %3215 = vadd.xlane.f32.xlu0 %v3214_v45 }
 0xbe1   : > { %v3213_v55 = vpop.xlane.xlu1 %3212 }
 0xbe2   : > { %v3221_v56 = vmul.f32 0.03125, %v3213_v55  ;;  %v3210_v58 = vpop.xlane.xlu0 %3209 }
 0xbe3   : > { %v3220_v60 = vmul.f32 0.03125, %v3210_v58 }
 0xbe4   : > { %v3225_v61 = vadd.f32 1e-06, %v3221_v56 }
 0xbe5   : > { %v3224_v10 = vadd.f32 1e-06, %v3220_v60  ;;  %v3219_v0 = vpop.xlane.xlu1 %3218 }
 0xbe6   : > { %5003 = vrsqrt.f32 %v3225_v61  ;;  %v3223_v6 = vmul.f32 0.03125, %v3219_v0  ;;  %v3216_v8 = vpop.xlane.xlu0 %3215 }
 0xbe7   : > { %5005 = vrsqrt.f32 %v3224_v10  ;;  %v3222_v44 = vmul.f32 0.03125, %v3216_v8 }
 0xbe8   : > { %v3227_v9 = vadd.f32 1e-06, %v3223_v6 }
 0xbe9   : > { %v3226_v48 = vadd.f32 1e-06, %v3222_v44 }
 0xbea   : > { %5007 = vrsqrt.f32 %v3227_v9 }
 0xbeb   : > { %5009 = vrsqrt.f32 %v3226_v48 }
 0xbf0   : > { %v5004_v11 = vpop.eup %5003 }
 0xbf1   : > { %v5006_v4 = vpop.eup %5005  ;;  %v3233_v1 = vmul.f32 %v5004_v11, %v3201_v28  ;;  %v3252_v28 = vld [vmem:[%s6026_s5 + $0x60] sm:$0xff] }
 0xbf2   : > { %v3232_v54 = vmul.f32 %v5006_v4, %v3200_v29  ;;  %v3253_v29 = vld [vmem:[%s6026_s5 + $0x68] sm:$0xff] }
 0xbf3   : > { %v4805_v30 = vpack.c.bf16 %v3253_v29, %v3252_v28 }
 0xbf4   : > { %v5008_v3 = vpop.eup %5007  ;;  %4647 = vmatprep.mubr.msk.f32.mxu0 %vm287_vm0, %v3232_v54 }
 0xbf5   : > { %v5010_v59 = vpop.eup %5009  ;;  %4648 = vmatmul.mubr.msk.f32.vlgmr.msra.gmra.mrb[18].mxu0 %vm287_vm0, %v3233_v1  ;;  %v3235_v62 = vmul.f32 %v5008_v3, %v3203_v36  ;;  %4806 = vmatprep.subr.bf16.mxu1 %v4805_v30 }
 0xbf6   : > { %v3234_v57 = vmul.f32 %v5010_v59, %v3202_v38  ;;  %4808 = vmatpush3.bf16.msra.mxu1 %v4805_v30 }
 0xbf7   : > { %4810 = vmatprep.subr.bf16.mxu1 %v4809_v33 }
 0xbf8   : > { %4650 = vmatprep.mubr.msk.f32.mxu0 %vm287_vm0, %v3234_v57 }
 0xbf9   : > { %4651 = vmatmul.mubr.msk.f32.gmra.mrb[20].mxu0 %vm287_vm0, %v3235_v62 }
 0xbfa   : > { %4812 = vmatpush3.bf16.msra.mxu1 %v4809_v33 }
 0xcc8   : > { %v4649_v35 = vpop.f32.mrb[18].mxu0 }
 0xcc9   : > { %v5731_v36 = vadd.f32 %v4649_v35, %v4281_v34  ;;  %v3339_v37 = vpop.f32.mrb[19].mxu0 }
 0xcca   : > { %v5733_v38 = vadd.f32 %v4281_v34, %v3339_v37 }
 0xccb   : > { %v5736_v39 = vmul.f32 0.70710677, %v5731_v36 }
 0xccc   : > { %v5739_v41 = vmul.f32 0.70710677, %v5733_v38  ;;  %v4652_v42 = vpop.f32.mrb[20].mxu0 }
 0xccd   : > { %v3375_v43 = vand.u32 2147483647, %v5736_v39  ;;  %v5742_v45 = vadd.f32 %v4652_v42, %v4281_v34  ;;  %v3349_v46 = vpop.f32.mrb[21].mxu0  ;;  %vm3367_vm13 = vcmp.ge.f32.partialorder %v5736_v39, 0.0 }
 0xcce   : > { %v3374_v47 = vand.u32 2147483647, %v5739_v41  ;;  %v5745_v50 = vadd.f32 %v4281_v34, %v3349_v46  ;;  %vm3366_vm14 = vcmp.ge.f32.partialorder %v5739_v41, 0.0 }
 0xccf   : > { %v3379_v51 = vmul.f32 0.3275911, %v3375_v43  ;;  %v5748_v53 = vmul.f32 0.70710677, %v5742_v45  ;;  %v3431_v8 = vsub.f32 0.0, %v3375_v43 }
 0xcd0   : > { %v3378_v52 = vmul.f32 0.3275911, %v3374_v47  ;;  %v5751_v56 = vmul.f32 0.70710677, %v5745_v50  ;;  %v3430_v9 = vsub.f32 0.0, %v3374_v47 }
 0xcd1   : > { %v3383_v55 = vadd.f32 1.0, %v3379_v51  ;;  %v3377_v60 = vand.u32 2147483647, %v5748_v53  ;;  %v3435_v11 = vmul.f32 %v3431_v8, %v3375_v43  ;;  %vm3369_vm15 = vcmp.ge.f32.partialorder %v5748_v53, 0.0 }
 0xcd2   : > { %v3382_v58 = vadd.f32 1.0, %v3378_v52  ;;  %v3376_v10 = vand.u32 2147483647, %v5751_v56  ;;  %v3434_v1 = vmul.f32 %v3430_v9, %v3374_v47  ;;  %vm3368_vm1 = vcmp.ge.f32.partialorder %v5751_v56, 0.0  ;;  %v4286_v56 = vld [vmem:[%s6027_s6 + $0x3] ss:$0 sm:$0xff] }
 0xcd3   : > { %5011 = vrcp.f32 %v3383_v55  ;;  %v3381_v61 = vmul.f32 0.3275911, %v3377_v60  ;;  %v3433_v3 = vsub.f32 0.0, %v3377_v60  ;;  %v3440_v62 = vmul.f32 1.442695, %v3435_v11 }
 0xcd4   : > { %5013 = vrcp.f32 %v3382_v58  ;;  %v3380_v6 = vmul.f32 0.3275911, %v3376_v10  ;;  %v3432_v63 = vsub.f32 0.0, %v3376_v10  ;;  %v3438_v40 = vmul.f32 1.442695, %v3434_v1 }
 0xcd5   : > { %v3385_v0 = vadd.f32 1.0, %v3381_v61  ;;  %v3437_v13 = vmul.f32 %v3433_v3, %v3377_v60  ;;  %v5131_v11 = vmov -1.0  }
 0xcd6   : > { %v3384_v44 = vadd.f32 1.0, %v3380_v6  ;;  %v3436_v18 = vmul.f32 %v3432_v63, %v3376_v10 }
 0xcd7   : > { %5015 = vrcp.f32 %v3385_v0  ;;  %v3444_v24 = vmul.f32 1.442695, %v3437_v13 }
 0xcd8   : > { %5017 = vrcp.f32 %v3384_v44  ;;  %v3442_v30 = vmul.f32 1.442695, %v3436_v18 }
 0xcd9   : > { %5019 = vpow2.f32 %v3440_v62 }
 0xcda   : > { %5021 = vpow2.f32 %v3438_v40 }
 0xcdb   : > { %5023 = vpow2.f32 %v3444_v24 }
 0xcdc   : > { %5025 = vpow2.f32 %v3442_v30 }
 0xcdd   : > { %v5012_v48 = vpop.eup %5011 }
 0xcde   : > { %v5014_v4 = vpop.eup %5013  ;;  %v3395_v54 = vmul.f32 1.0614054, %v5012_v48 }
 0xcdf   : > { %v3394_v59 = vmul.f32 1.0614054, %v5014_v4 }
 0xce0   : > { %v3399_v57 = vadd.f32 -1.4531521, %v3395_v54  ;;  %v3371_v54 = vsel %vm3367_vm13, 1.0, %v5131_v11 }
 0xce1   : > { %v3398_v2 = vadd.f32 -1.4531521, %v3394_v59  ;;  %v5016_v5 = vpop.eup %5015 }
 0xce2   : > { %v3403_v7 = vmul.f32 %v5012_v48, %v3399_v57  ;;  %v3397_v15 = vmul.f32 1.0614054, %v5016_v5  ;;  %v5018_v17 = vpop.eup %5017 }
 0xce3   : > { %v3402_v14 = vmul.f32 %v5014_v4, %v3398_v2  ;;  %v3396_v25 = vmul.f32 1.0614054, %v5018_v17  ;;  %v5020_v55 = vpop.eup %5019 }
 0xce4   : > { %v3407_v16 = vadd.f32 1.4214138, %v3403_v7  ;;  %v3401_v22 = vadd.f32 -1.4531521, %v3397_v15  ;;  %v5022_v61 = vpop.eup %5021  ;;  %v3358_v7 = vmul.f32 0.5, %v5733_v38  ;;  %v3360_v38 = vmul.f32 0.5, %v5745_v50 }
 0xce5   : > { %v3406_v19 = vadd.f32 1.4214138, %v3402_v14  ;;  %v3400_v29 = vadd.f32 -1.4531521, %v3396_v25  ;;  %v5024_v3 = vpop.eup %5023  ;;  %v3359_v14 = vmul.f32 0.5, %v5731_v36  ;;  %v3361_v36 = vmul.f32 0.5, %v5742_v45 }
 0xce6   : > { %v3411_v23 = vmul.f32 %v5012_v48, %v3407_v16  ;;  %v3405_v27 = vmul.f32 %v5016_v5, %v3401_v22  ;;  %v5026_v2 = vpop.eup %5025  ;;  %v3372_v22 = vsel %vm3368_vm1, 1.0, %v5131_v11 }
 0xce7   : > { %v3410_v26 = vmul.f32 %v5014_v4, %v3406_v19  ;;  %v3404_v34 = vmul.f32 %v5018_v17, %v3400_v29 }
 0xce8   : > { %v3415_v28 = vadd.f32 -0.28449672, %v3411_v23  ;;  %v3409_v32 = vadd.f32 1.4214138, %v3405_v27 }
 0xce9   : > { %v3414_v31 = vadd.f32 -0.28449672, %v3410_v26  ;;  %v3408_v43 = vadd.f32 1.4214138, %v3404_v34 }
 0xcea   : > { %v3419_v33 = vmul.f32 %v5012_v48, %v3415_v28  ;;  %v3413_v37 = vmul.f32 %v5016_v5, %v3409_v32 }
 0xceb   : > { %v3418_v35 = vmul.f32 %v5014_v4, %v3414_v31  ;;  %v3412_v52 = vmul.f32 %v5018_v17, %v3408_v43 }
 0xcec   : > { %v3423_v42 = vadd.f32 0.2548296, %v3419_v33  ;;  %v3417_v47 = vadd.f32 -0.28449672, %v3413_v37 }
 0xced   : > { %v3422_v46 = vadd.f32 0.2548296, %v3418_v35  ;;  %v3416_v0 = vadd.f32 -0.28449672, %v3412_v52 }
 0xcee   : > { %v3427_v51 = vmul.f32 %v5012_v48, %v3423_v42  ;;  %v3421_v60 = vmul.f32 %v5016_v5, %v3417_v47 }
 0xcef   : > { %v3426_v58 = vmul.f32 %v5014_v4, %v3422_v46  ;;  %v3420_v9 = vmul.f32 %v5018_v17, %v3416_v0  ;;  %v3370_v4 = vsel %vm3366_vm14, 1.0, %v5131_v11 }
 0xcf0   : > { %v3447_v10 = vmul.f32 %v5020_v55, %v3427_v51  ;;  %v3425_v8 = vadd.f32 0.2548296, %v3421_v60 }
 0xcf1   : > { %v3446_v6 = vmul.f32 %v5022_v61, %v3426_v58  ;;  %v3424_v57 = vadd.f32 0.2548296, %v3420_v9 }
 0xcf2   : > { %v3451_v44 = vsub.f32 1.0, %v3447_v10  ;;  %v3429_v48 = vmul.f32 %v5016_v5, %v3425_v8  ;;  %v3373_v5 = vsel %vm3369_vm15, 1.0, %v5131_v11 }
 0xcf3   : > { %v3450_v1 = vsub.f32 1.0, %v3446_v6  ;;  %v3428_v41 = vmul.f32 %v5018_v17, %v3424_v57  ;;  %v3630_v57 = vld [vmem:[%s6024_s3 + $0x30] sm:$0xff] }
 0xcf4   : > { %v3455_v59 = vmul.f32 %v3451_v44, %v3371_v54  ;;  %v3449_v62 = vmul.f32 %v5024_v3, %v3429_v48 }
 0xcf5   : > { %v3454_v39 = vmul.f32 %v3450_v1, %v3370_v4  ;;  %v3448_v15 = vmul.f32 %v5026_v2, %v3428_v41  ;;  %v3629_v4 = vld [vmem:[%s6024_s3 + $0x28] sm:$0xff] }
 0xcf6   : > { %v3459_v63 = vadd.f32 1.0, %v3455_v59  ;;  %v3453_v13 = vsub.f32 1.0, %v3449_v62  ;;  %v3628_v59 = vld [vmem:[%s6024_s3 + $0x20] sm:$0xff]  ;;  %v3631_v62 = vld [vmem:[%s6024_s3 + $0x38] sm:$0xff] }
 0xcf7   : > { %v3458_v40 = vadd.f32 1.0, %v3454_v39  ;;  %v3452_v53 = vsub.f32 1.0, %v3448_v15  ;;  %v4813_v39 = vpack.c.bf16 %v3629_v4, %v3628_v59 }
 0xcf8   : > { %v3457_v18 = vmul.f32 %v3453_v13, %v3373_v5  ;;  %v3463_v19 = vmul.f32 %v3459_v63, %v3359_v14  ;;  %v4817_v63 = vpack.c.bf16 %v3631_v62, %v3630_v57 }
 0xcf9   : > { %v3462_v16 = vmul.f32 %v3458_v40, %v3358_v7  ;;  %v3456_v17 = vmul.f32 %v3452_v53, %v3372_v22  ;;  %4814 = vmatprep.subr.bf16.mxu0 %v4813_v39 }
 0xcfa   : > { %v3461_v23 = vadd.f32 1.0, %v3457_v18  ;;  %4816 = vmatpush3.bf16.msra.mxu0 %v4813_v39 }
 0xcfb   : > { %4685 = vmatprep.mubr.f32.mxu1 %v3462_v16  ;;  %v3460_v24 = vadd.f32 1.0, %v3456_v17  ;;  %4818 = vmatprep.subr.bf16.mxu0 %v4817_v63  ;;  %v3613_v17 = vld [vmem:[%s6022_s1 + $0x8] sm:$0xff] }
 0xcfc   : > { %4686 = vmatmul.mubr.f32.vlgmr.msra.gmra.mrb[30].mxu1 %v3463_v19  ;;  %v3465_v26 = vmul.f32 %v3461_v23, %v3361_v36  ;;  %v3615_v23 = vld [vmem:[%s6022_s1 + $0x18] sm:$0xff]  ;;  %v3612_v36 = vld [vmem:[%s6022_s1] sm:$0xff] }
 0xcfd   : > { %v3464_v25 = vmul.f32 %v3460_v24, %v3360_v38 }
 0xcfe   : > { %4820 = vmatpush3.bf16.msra.mxu0 %v4817_v63 }
 0xcff   : > { %4688 = vmatprep.mubr.f32.mxu1 %v3464_v25  ;;  %v3614_v25 = vld [vmem:[%s6022_s1 + $0x10] sm:$0xff] }
 0xd00   : > { %4689 = vmatmul.mubr.f32.gmra.mrb[32].mxu1 %v3465_v26 }
 0xdcf   : > { %v4687_v27 = vpop.f32.mrb[30].mxu1 }
 0xdd0   : > { %v3543_v28 = vadd.f32 %v4687_v27, %v4286_v56  ;;  %v3537_v29 = vpop.f32.mrb[31].mxu1 }
 0xdd1   : > { %v3538_v30 = vadd.f32 %v4286_v56, %v3537_v29 }
 0xdd2   : > { %v5771_v31 = vadd.f32 %v3543_v28, %v5638_v49 }
 0xdd3   : > { %v5774_v50 = vadd.f32 %v3538_v30, %v5640_v12  ;;  %v4690_v33 = vpop.f32.mrb[32].mxu1 }
 0xdd4   : > { %v3563_v45 = vsel %vm287_vm0, %v5771_v31, 0.0  ;;  %v3553_v34 = vadd.f32 %v4690_v33, %v4286_v56  ;;  %v3547_v35 = vpop.f32.mrb[33].mxu1 }
 0xdd5   : > { %3564 = vadd.xlane.f32.xlu1 %v3563_v45  ;;  %v3560_v32 = vsel %vm287_vm0, %v5774_v50, 0.0  ;;  %v3548_v37 = vadd.f32 %v4286_v56, %v3547_v35 }
 0xdd6   : > { %3561 = vadd.xlane.f32.xlu0 %v3560_v32  ;;  %v5781_v42 = vadd.f32 %v3553_v34, %v5648_v20 }
 0xdd7   : > { %v5784_v49 = vadd.f32 %v3548_v37, %v5650_v21 }
 0xdd8   : > { %v3569_v12 = vsel %vm287_vm0, %v5781_v42, 0.0 }
 0xdd9   : > { %3570 = vadd.xlane.f32.xlu1 %v3569_v12  ;;  %v3566_v43 = vsel %vm287_vm0, %v5784_v49, 0.0 }
 0xdda   : > { %3567 = vadd.xlane.f32.xlu0 %v3566_v43 }
 0xe62   : > { %v3565_v46 = vpop.xlane.xlu1 %3564 }
 0xe63   : > { %v3573_v47 = vmul.f32 0.03125, %v3565_v46  ;;  %v3562_v51 = vpop.xlane.xlu0 %3561 }
 0xe64   : > { %v3572_v52 = vmul.f32 0.03125, %v3562_v51 }
 0xe65   : > { %v3577_v55 = vsub.f32 %v5771_v31, %v3573_v47 }
 0xe66   : > { %v3576_v20 = vsub.f32 %v5774_v50, %v3572_v52  ;;  %v3571_v21 = vpop.xlane.xlu1 %3570 }
 0xe67   : > { %v3581_v58 = vmul.f32 %v3577_v55, %v3577_v55  ;;  %v3575_v10 = vmul.f32 0.03125, %v3571_v21  ;;  %v3568_v0 = vpop.xlane.xlu0 %3567 }
 0xe68   : > { %v3580_v60 = vmul.f32 %v3576_v20, %v3576_v20  ;;  %v3574_v8 = vmul.f32 0.03125, %v3568_v0 }
 0xe69   : > { %v3587_v61 = vsel %vm287_vm0, %v3581_v58, 0.0  ;;  %v3579_v44 = vsub.f32 %v5781_v42, %v3575_v10 }
 0xe6a   : > { %3588 = vadd.xlane.f32.xlu1 %v3587_v61  ;;  %v3584_v6 = vsel %vm287_vm0, %v3580_v60, 0.0  ;;  %v3578_v9 = vsub.f32 %v5784_v49, %v3574_v8 }
 0xe6b   : > { %3585 = vadd.xlane.f32.xlu0 %v3584_v6  ;;  %v3583_v54 = vmul.f32 %v3579_v44, %v3579_v44 }
 0xe6c   : > { %v3582_v1 = vmul.f32 %v3578_v9, %v3578_v9 }
 0xe6d   : > { %v3593_v48 = vsel %vm287_vm0, %v3583_v54, 0.0 }
 0xe6e   : > { %3594 = vadd.xlane.f32.xlu1 %v3593_v48  ;;  %v3590_v3 = vsel %vm287_vm0, %v3582_v1, 0.0 }
 0xe6f   : > { %3591 = vadd.xlane.f32.xlu0 %v3590_v3 }
 0xef7   : > { %v3589_v41 = vpop.xlane.xlu1 %3588 }
 0xef8   : > { %v3597_v2 = vmul.f32 0.03125, %v3589_v41  ;;  %v3586_v7 = vpop.xlane.xlu0 %3585 }
 0xef9   : > { %v3596_v40 = vmul.f32 0.03125, %v3586_v7 }
 0xefa   : > { %v3601_v13 = vadd.f32 1e-06, %v3597_v2 }
 0xefb   : > { %v3600_v14 = vadd.f32 1e-06, %v3596_v40  ;;  %v3595_v5 = vpop.xlane.xlu1 %3594 }
 0xefc   : > { %5027 = vrsqrt.f32 %v3601_v13  ;;  %v3599_v15 = vmul.f32 0.03125, %v3595_v5  ;;  %v3592_v16 = vpop.xlane.xlu0 %3591 }
 0xefd   : > { %5029 = vrsqrt.f32 %v3600_v14  ;;  %v3598_v18 = vmul.f32 0.03125, %v3592_v16 }
 0xefe   : > { %v3603_v19 = vadd.f32 1e-06, %v3599_v15 }
 0xeff   : > { %v3602_v53 = vadd.f32 1e-06, %v3598_v18 }
 0xf00   : > { %5031 = vrsqrt.f32 %v3603_v19  ;;  %v3794_v19 = vld [vmem:[%s6025_s4 + $0x8] sm:$0xff] }
 0xf01   : > { %5033 = vrsqrt.f32 %v3602_v53  ;;  %v3795_v53 = vld [vmem:[%s6025_s4 + $0x18] sm:$0xff] }
 0xf06   : > { %v5028_v22 = vpop.eup %5027 }
 0xf07   : > { %v5030_v38 = vpop.eup %5029  ;;  %v3609_v24 = vmul.f32 %v5028_v22, %v3577_v55  ;;  %v4291_v55 = vld [vmem:[%s6027_s6 + $0x4] ss:$0 sm:$0xff]  ;;  %v4821_v22 = vpack.c.bf16 %v3795_v53, %v3794_v19 }
 0xf08   : > { %v3608_v26 = vmul.f32 %v5030_v38, %v3576_v20 }
 0xf09   : > { %v3618_v56 = vmul.f32 %v3613_v17, %v3609_v24  ;;  %v3624_v27 = vmul.f32 %v3615_v23, %v3609_v24  ;;  %4822 = vmatprep.subr.bf16.mxu0 %v4821_v22 }
 0xf0a   : > { %v3616_v28 = vmul.f32 %v3612_v36, %v3608_v26  ;;  %v3622_v29 = vmul.f32 %v3614_v25, %v3608_v26  ;;  %v5032_v32 = vpop.eup %5031 }
 0xf0b   : > { %v5034_v33 = vpop.eup %5033  ;;  %v3611_v34 = vmul.f32 %v5032_v32, %v3579_v44 }
 0xf0c   : > { %v3620_v30 = vadd.f32 %v3618_v56, %v3616_v28  ;;  %v3626_v45 = vadd.f32 %v3624_v27, %v3622_v29  ;;  %v3610_v35 = vmul.f32 %v5034_v33, %v3578_v9 }
 0xf0d   : > { %v3619_v37 = vmul.f32 %v3613_v17, %v3611_v34  ;;  %v3625_v12 = vmul.f32 %v3615_v23, %v3611_v34  ;;  %v3796_v17 = vld [vmem:[%s6025_s4 + $0x28] sm:$0xff]  ;;  %v3797_v23 = vld [vmem:[%s6025_s4 + $0x38] sm:$0xff] }
 0xf0e   : > { %4699 = vmatprep.mubr.msk.f32.mxu0 %vm287_vm0, %v3620_v30  ;;  %v3617_v43 = vmul.f32 %v3612_v36, %v3610_v35  ;;  %v3623_v46 = vmul.f32 %v3614_v25, %v3610_v35  ;;  %v4825_v38 = vpack.c.bf16 %v3797_v23, %v3796_v17 }
 0xf0f   : > { %4700 = vmatmul.mubr.msk.f32.vlgmr.msra.gmra.mrb[22].mxu0 %vm287_vm0, %v3626_v45 }
 0xf10   : > { %v3621_v47 = vadd.f32 %v3619_v37, %v3617_v43  ;;  %v3627_v51 = vadd.f32 %v3625_v12, %v3623_v46  ;;  %4824 = vmatpush3.bf16.msra.mxu0 %v4821_v22 }
 0xf11   : > { %4826 = vmatprep.subr.bf16.mxu0 %v4825_v38 }
 0xf12   : > { %4702 = vmatprep.mubr.msk.f32.mxu0 %vm287_vm0, %v3621_v47 }
 0xf13   : > { %4703 = vmatmul.mubr.msk.f32.gmra.mrb[24].mxu0 %vm287_vm0, %v3627_v51 }
 0xf14   : > { %4828 = vmatpush3.bf16.msra.mxu0 %v4825_v38 }
 0xfe2   : > { %v4701_v52 = vpop.f32.mrb[22].mxu0 }
 0xfe3   : > { %v3730_v20 = vadd.f32 %v4701_v52, %v5771_v31  ;;  %v3710_v58 = vpop.f32.mrb[23].mxu0  ;;  %v3798_v52 = vld [vmem:[%s6026_s5 + $0x80] sm:$0xff] }
 0xfe4   : > { %v3729_v60 = vadd.f32 %v3710_v58, %v5774_v50  ;;  %v3800_v58 = vld [vmem:[%s6026_s5 + $0x90] sm:$0xff] }
 0xfe5   : > { %v5831_v21 = vadd.f32 %v4291_v55, %v3730_v20 }
 0xfe6   : > { %v5833_v61 = vadd.f32 %v4291_v55, %v3729_v60  ;;  %v4704_v6 = vpop.f32.mrb[24].mxu0  ;;  %v3801_v60 = vld [vmem:[%s6026_s5 + $0x98] sm:$0xff] }
 0xfe7   : > { %v3745_v10 = vsel %vm287_vm0, %v5831_v21, 0.0  ;;  %v3732_v8 = vadd.f32 %v4704_v6, %v5781_v42  ;;  %v3720_v44 = vpop.f32.mrb[25].mxu0  ;;  %v3803_v6 = vld [vmem:[%s6026_s5 + $0xa8] sm:$0xff] }
 0xfe8   : > { %3746 = vadd.xlane.f32.xlu1 %v3745_v10  ;;  %v3742_v0 = vsel %vm287_vm0, %v5833_v61, 0.0  ;;  %v3731_v31 = vadd.f32 %v3720_v44, %v5784_v49  ;;  %v4833_v10 = vpack.c.bf16 %v3801_v60, %v3800_v58  ;;  %v3804_v44 = vld [vmem:[%s6026_s5 + $0xb0] sm:$0xff] }
 0xfe9   : > { %3743 = vadd.xlane.f32.xlu0 %v3742_v0  ;;  %v5841_v9 = vadd.f32 %v4291_v55, %v3732_v8  ;;  %v3802_v0 = vld [vmem:[%s6026_s5 + $0xa0] sm:$0xff] }
 0xfea   : > { %v5843_v50 = vadd.f32 %v4291_v55, %v3731_v31  ;;  %v3799_v55 = vld [vmem:[%s6026_s5 + $0x88] sm:$0xff]  ;;  %v4837_v8 = vpack.c.bf16 %v3803_v6, %v3802_v0  ;;  %v3805_v31 = vld [vmem:[%s6026_s5 + $0xb8] sm:$0xff] }
 0xfeb   : > { %v3751_v54 = vsel %vm287_vm0, %v5841_v9, 0.0  ;;  %v4829_v20 = vpack.c.bf16 %v3799_v55, %v3798_v52 }
 0xfec   : > { %3752 = vadd.xlane.f32.xlu1 %v3751_v54  ;;  %v3748_v1 = vsel %vm287_vm0, %v5843_v50, 0.0  ;;  %v4841_v54 = vpack.c.bf16 %v3805_v31, %v3804_v44 }
 0xfed   : > { %3749 = vadd.xlane.f32.xlu0 %v3748_v1  ;;  %4830 = vmatprep.subr.bf16.mxu0 %v4829_v20  ;;  %v3806_v1 = vld [vmem:[%s6026_s5 + $0xc0] sm:$0xff] }
0x1075   : > { %v3747_v48 = vpop.xlane.xlu1 %3746 }
0x1076   : > { %v3755_v3 = vmul.f32 0.03125, %v3747_v48  ;;  %v3744_v59 = vpop.xlane.xlu0 %3743  ;;  %v3807_v48 = vld [vmem:[%s6026_s5 + $0xc8] sm:$0xff] }
0x1077   : > { %v3754_v4 = vmul.f32 0.03125, %v3744_v59  ;;  %v3808_v59 = vld [vmem:[%s6026_s5 + $0xd0] sm:$0xff] }
0x1078   : > { %v3759_v42 = vsub.f32 %v5831_v21, %v3755_v3  ;;  %v4845_v3 = vpack.c.bf16 %v3807_v48, %v3806_v1 }
0x1079   : > { %v3758_v49 = vsub.f32 %v5833_v61, %v3754_v4  ;;  %v3753_v62 = vpop.xlane.xlu1 %3752  ;;  %v3809_v4 = vld [vmem:[%s6026_s5 + $0xd8] sm:$0xff] }
0x107a   : > { %v3763_v57 = vmul.f32 %v3759_v42, %v3759_v42  ;;  %v3757_v41 = vmul.f32 0.03125, %v3753_v62  ;;  %v3750_v2 = vpop.xlane.xlu0 %3749  ;;  %v3812_v62 = vld [vmem:[%s6026_s5 + $0xf0] sm:$0xff] }
0x107b   : > { %v3762_v39 = vmul.f32 %v3758_v49, %v3758_v49  ;;  %v3756_v40 = vmul.f32 0.03125, %v3750_v2  ;;  %v4292_v2 = vld [vmem:[%s6027_s6 + $0x5] ss:$0 sm:$0xff] }
0x107c   : > { %v3769_v63 = vsel %vm287_vm0, %v3763_v57, 0.0  ;;  %v3761_v13 = vsub.f32 %v5841_v9, %v3757_v41  ;;  %v3811_v57 = vld [vmem:[%s6026_s5 + $0xe8] sm:$0xff] }
0x107d   : > { %3770 = vadd.xlane.f32.xlu1 %v3769_v63  ;;  %v3766_v7 = vsel %vm287_vm0, %v3762_v39, 0.0  ;;  %v3760_v14 = vsub.f32 %v5843_v50, %v3756_v40  ;;  %v3813_v63 = vld [vmem:[%s6026_s5 + $0xf8] sm:$0xff] }
0x107e   : > { %3767 = vadd.xlane.f32.xlu0 %v3766_v7  ;;  %v3765_v5 = vmul.f32 %v3761_v13, %v3761_v13  ;;  %v4857_v41 = vpack.c.bf16 %v3813_v63, %v3812_v62 }
0x107f   : > { %v3764_v15 = vmul.f32 %v3760_v14, %v3760_v14 }
0x1080   : > { %v3775_v16 = vsel %vm287_vm0, %v3765_v5, 0.0 }
0x1081   : > { %3776 = vadd.xlane.f32.xlu1 %v3775_v16  ;;  %v3772_v18 = vsel %vm287_vm0, %v3764_v15, 0.0 }
0x1082   : > { %3773 = vadd.xlane.f32.xlu0 %v3772_v18 }
0x110a   : > { %v3771_v24 = vpop.xlane.xlu1 %3770 }
0x110b   : > { %v3779_v36 = vmul.f32 0.03125, %v3771_v24  ;;  %v3768_v25 = vpop.xlane.xlu0 %3767 }
0x110c   : > { %v3778_v26 = vmul.f32 0.03125, %v3768_v25 }
0x110d   : > { %v3783_v56 = vadd.f32 1e-06, %v3779_v36 }
0x110e   : > { %v3782_v27 = vadd.f32 1e-06, %v3778_v26  ;;  %v3777_v28 = vpop.xlane.xlu1 %3776 }
0x110f   : > { %5035 = vrsqrt.f32 %v3783_v56  ;;  %v3781_v29 = vmul.f32 0.03125, %v3777_v28  ;;  %v3774_v30 = vpop.xlane.xlu0 %3773 }
0x1110   : > { %5037 = vrsqrt.f32 %v3782_v27  ;;  %v3780_v45 = vmul.f32 0.03125, %v3774_v30 }
0x1111   : > { %v3785_v32 = vadd.f32 1e-06, %v3781_v29 }
0x1112   : > { %v3784_v33 = vadd.f32 1e-06, %v3780_v45 }
0x1113   : > { %5039 = vrsqrt.f32 %v3785_v32 }
0x1114   : > { %5041 = vrsqrt.f32 %v3784_v33 }
0x1119   : > { %v5036_v34 = vpop.eup %5035 }
0x111a   : > { %v5038_v35 = vpop.eup %5037  ;;  %v3791_v12 = vmul.f32 %v5036_v34, %v3759_v42  ;;  %v4849_v42 = vpack.c.bf16 %v3809_v4, %v3808_v59 }
0x111b   : > { %v3790_v37 = vmul.f32 %v5038_v35, %v3758_v49  ;;  %v3810_v49 = vld [vmem:[%s6026_s5 + $0xe0] sm:$0xff] }
0x111c   : > { %v4853_v39 = vpack.c.bf16 %v3811_v57, %v3810_v49 }
0x111d   : > { %4713 = vmatprep.mubr.msk.f32.mxu0 %vm287_vm0, %v3790_v37  ;;  %v5040_v43 = vpop.eup %5039 }
0x111e   : > { %4714 = vmatmul.mubr.msk.f32.vlgmr.msra.gmra.mrb[26].mxu0 %vm287_vm0, %v3791_v12  ;;  %v5042_v46 = vpop.eup %5041  ;;  %v3793_v51 = vmul.f32 %v5040_v43, %v3761_v13 }
0x111f   : > { %v3792_v47 = vmul.f32 %v5042_v46, %v3760_v14  ;;  %4832 = vmatpush3.bf16.msra.mxu0 %v4829_v20 }
0x1120   : > { %4834 = vmatprep.subr.bf16.mxu0 %v4833_v10 }
0x1121   : > { %4716 = vmatprep.mubr.msk.f32.mxu0 %vm287_vm0, %v3792_v47 }
0x1122   : > { %4717 = vmatmul.mubr.msk.f32.gmra.mrb[28].mxu0 %vm287_vm0, %v3793_v51 }
0x1123   : > { %4836 = vmatpush3.bf16.msra.mxu0 %v4833_v10 }
0x1124   : > { %4838 = vmatprep.subr.bf16.mxu0 %v4837_v8 }
0x1127   : > { %4840 = vmatpush3.bf16.msra.mxu0 %v4837_v8 }
0x1128   : > { %4842 = vmatprep.subr.bf16.mxu0 %v4841_v54 }
0x112b   : > { %4844 = vmatpush3.bf16.msra.mxu0 %v4841_v54 }
0x112c   : > { %4846 = vmatprep.subr.bf16.mxu0 %v4845_v3 }
0x112f   : > { %4848 = vmatpush3.bf16.msra.mxu0 %v4845_v3 }
0x1130   : > { %4850 = vmatprep.subr.bf16.mxu0 %v4849_v42 }
0x1133   : > { %4852 = vmatpush3.bf16.msra.mxu0 %v4849_v42 }
0x1134   : > { %4854 = vmatprep.subr.bf16.mxu0 %v4853_v39 }
0x1137   : > { %4856 = vmatpush3.bf16.msra.mxu0 %v4853_v39 }
0x1138   : > { %4858 = vmatprep.subr.bf16.mxu0 %v4857_v41 }
0x113b   : > { %4860 = vmatpush3.bf16.msra.mxu0 %v4857_v41 }
0x11f1   : > { %v4715_v7 = vpop.f32.mrb[26].mxu0 }
0x11f2   : > { %v5924_v40 = vadd.f32 %v4715_v7, %v4292_v2  ;;  %v3897_v13 = vpop.f32.mrb[27].mxu0 }
0x11f3   : > { %v5926_v14 = vadd.f32 %v4292_v2, %v3897_v13 }
0x11f4   : > { %v5929_v5 = vmul.f32 0.70710677, %v5924_v40 }
0x11f5   : > { %v5932_v15 = vmul.f32 0.70710677, %v5926_v14  ;;  %v4718_v53 = vpop.f32.mrb[28].mxu0 }
0x11f6   : > { %v3933_v16 = vand.u32 2147483647, %v5929_v5  ;;  %v5936_v17 = vadd.f32 %v4718_v53, %v4292_v2  ;;  %v3907_v23 = vpop.f32.mrb[29].mxu0  ;;  %vm3925_vm2 = vcmp.ge.f32.partialorder %v5929_v5, 0.0 }
0x11f7   : > { %v3932_v18 = vand.u32 2147483647, %v5932_v15  ;;  %v5938_v24 = vadd.f32 %v4292_v2, %v3907_v23  ;;  %vm3924_vm3 = vcmp.ge.f32.partialorder %v5932_v15, 0.0  ;;  %v3916_v15 = vmul.f32 0.5, %v5926_v14 }
0x11f8   : > { %v3937_v19 = vmul.f32 0.3275911, %v3933_v16  ;;  %v5941_v25 = vmul.f32 0.70710677, %v5936_v17  ;;  %v3989_v45 = vsub.f32 0.0, %v3933_v16 }
0x11f9   : > { %v3936_v22 = vmul.f32 0.3275911, %v3932_v18  ;;  %v5944_v26 = vmul.f32 0.70710677, %v5938_v24  ;;  %v3988_v33 = vsub.f32 0.0, %v3932_v18 }
0x11fa   : > { %v3941_v38 = vadd.f32 1.0, %v3937_v19  ;;  %v3935_v56 = vand.u32 2147483647, %v5941_v25  ;;  %v3993_v35 = vmul.f32 %v3989_v45, %v3933_v16  ;;  %vm3927_vm4 = vcmp.ge.f32.partialorder %v5941_v25, 0.0 }
0x11fb   : > { %v3940_v36 = vadd.f32 1.0, %v3936_v22  ;;  %v3934_v27 = vand.u32 2147483647, %v5944_v26  ;;  %v3992_v43 = vmul.f32 %v3988_v33, %v3932_v18  ;;  %vm3926_vm5 = vcmp.ge.f32.partialorder %v5944_v26, 0.0 }
0x11fc   : > { %5043 = vrcp.f32 %v3941_v38  ;;  %v3939_v28 = vmul.f32 0.3275911, %v3935_v56  ;;  %v3991_v51 = vsub.f32 0.0, %v3935_v56  ;;  %v3998_v52 = vmul.f32 1.442695, %v3993_v35 }
0x11fd   : > { %5045 = vrcp.f32 %v3940_v36  ;;  %v3938_v29 = vmul.f32 0.3275911, %v3934_v27  ;;  %v3990_v55 = vsub.f32 0.0, %v3934_v27  ;;  %v3996_v60 = vmul.f32 1.442695, %v3992_v43 }
0x11fe   : > { %v3943_v30 = vadd.f32 1.0, %v3939_v28  ;;  %v3995_v8 = vmul.f32 %v3991_v51, %v3935_v56  ;;  %v3929_v35 = vsel %vm3925_vm2, 1.0, %v5131_v11  ;;  %v3919_v26 = vmul.f32 0.5, %v5936_v17 }
0x11ff   : > { %v3942_v32 = vadd.f32 1.0, %v3938_v29  ;;  %v3994_v31 = vmul.f32 %v3990_v55, %v3934_v27 }
0x1200   : > { %5047 = vrcp.f32 %v3943_v30  ;;  %v4002_v49 = vmul.f32 1.442695, %v3995_v8 }
0x1201   : > { %5049 = vrcp.f32 %v3942_v32  ;;  %v4000_v39 = vmul.f32 1.442695, %v3994_v31 }
0x1202   : > { %5051 = vpow2.f32 %v3998_v52 }
0x1203   : > { %5053 = vpow2.f32 %v3996_v60 }
0x1204   : > { %5055 = vpow2.f32 %v4002_v49 }
0x1205   : > { %5057 = vpow2.f32 %v4000_v39 }
0x1206   : > { %v5044_v34 = vpop.eup %5043 }
0x1207   : > { %v5046_v37 = vpop.eup %5045  ;;  %v3953_v12 = vmul.f32 1.0614054, %v5044_v34 }
0x1208   : > { %v3952_v46 = vmul.f32 1.0614054, %v5046_v37 }
0x1209   : > { %v3957_v47 = vadd.f32 -1.4531521, %v3953_v12 }
0x120a   : > { %v3956_v20 = vadd.f32 -1.4531521, %v3952_v46  ;;  %v5048_v0 = vpop.eup %5047  ;;  %v3928_v46 = vsel %vm3924_vm3, 1.0, %v5131_v11 }
0x120b   : > { %v3961_v58 = vmul.f32 %v5044_v34, %v3957_v47  ;;  %v5050_v44 = vpop.eup %5049  ;;  %v3955_v1 = vmul.f32 1.0614054, %v5048_v0 }
0x120c   : > { %v3960_v10 = vmul.f32 %v5046_v37, %v3956_v20  ;;  %v3954_v3 = vmul.f32 1.0614054, %v5050_v44  ;;  %v5052_v38 = vpop.eup %5051 }
0x120d   : > { %v3965_v6 = vadd.f32 1.4214138, %v3961_v58  ;;  %v3959_v4 = vadd.f32 -1.4531521, %v3955_v1  ;;  %v5054_v27 = vpop.eup %5053 }
0x120e   : > { %v3964_v54 = vadd.f32 1.4214138, %v3960_v10  ;;  %v3958_v57 = vadd.f32 -1.4531521, %v3954_v3  ;;  %v5056_v52 = vpop.eup %5055  ;;  %v3917_v10 = vmul.f32 0.5, %v5924_v40  ;;  %v3918_v3 = vmul.f32 0.5, %v5938_v24 }
0x120f   : > { %v3969_v48 = vmul.f32 %v5044_v34, %v3965_v6  ;;  %v3963_v63 = vmul.f32 %v5048_v0, %v3959_v4  ;;  %v5058_v20 = vpop.eup %5057 }
0x1210   : > { %v3968_v59 = vmul.f32 %v5046_v37, %v3964_v54  ;;  %v3962_v2 = vmul.f32 %v5050_v44, %v3958_v57 }
0x1211   : > { %v3973_v42 = vadd.f32 -0.28449672, %v3969_v48  ;;  %v3967_v13 = vadd.f32 1.4214138, %v3963_v63 }
0x1212   : > { %v3972_v62 = vadd.f32 -0.28449672, %v3968_v59  ;;  %v3966_v18 = vadd.f32 1.4214138, %v3962_v2 }
0x1213   : > { %v3977_v41 = vmul.f32 %v5044_v34, %v3973_v42  ;;  %v3971_v53 = vmul.f32 %v5048_v0, %v3967_v13 }
0x1214   : > { %v3976_v7 = vmul.f32 %v5046_v37, %v3972_v62  ;;  %v3970_v23 = vmul.f32 %v5050_v44, %v3966_v18 }
0x1215   : > { %v3981_v16 = vadd.f32 0.2548296, %v3977_v41  ;;  %v3975_v56 = vadd.f32 -0.28449672, %v3971_v53 }
0x1216   : > { %v3980_v19 = vadd.f32 0.2548296, %v3976_v7  ;;  %v3974_v29 = vadd.f32 -0.28449672, %v3970_v23 }
0x1217   : > { %v3985_v22 = vmul.f32 %v5044_v34, %v3981_v16  ;;  %v3979_v45 = vmul.f32 %v5048_v0, %v3975_v56 }
0x1218   : > { %v3984_v36 = vmul.f32 %v5046_v37, %v3980_v19  ;;  %v3978_v33 = vmul.f32 %v5050_v44, %v3974_v29 }
0x1219   : > { %v4005_v28 = vmul.f32 %v5052_v38, %v3985_v22  ;;  %v3983_v43 = vadd.f32 0.2548296, %v3979_v45 }
0x121a   : > { %v4004_v30 = vmul.f32 %v5054_v27, %v3984_v36  ;;  %v3982_v37 = vadd.f32 0.2548296, %v3978_v33 }
0x121b   : > { %v4009_v32 = vsub.f32 1.0, %v4005_v28  ;;  %v3987_v51 = vmul.f32 %v5048_v0, %v3983_v43  ;;  %v3931_v0 = vsel %vm3927_vm4, 1.0, %v5131_v11 }
0x121c   : > { %v4008_v12 = vsub.f32 1.0, %v4004_v30  ;;  %v3986_v55 = vmul.f32 %v5050_v44, %v3982_v37  ;;  %v3930_v44 = vsel %vm3926_vm5, 1.0, %v5131_v11  ;;  %v4297_v11 = vld [vmem:[%s6027_s6 + $0x6] ss:$0 sm:$0xff] }
0x121d   : > { %v4013_v34 = vmul.f32 %v4009_v32, %v3929_v35  ;;  %v4007_v60 = vmul.f32 %v5056_v52, %v3987_v51 }
0x121e   : > { %v4012_v47 = vmul.f32 %v4008_v12, %v3928_v46  ;;  %v4006_v6 = vmul.f32 %v5058_v20, %v3986_v55 }
0x121f   : > { %v4017_v5 = vadd.f32 1.0, %v4013_v34  ;;  %v4011_v31 = vsub.f32 1.0, %v4007_v60 }
0x1220   : > { %v4016_v58 = vadd.f32 1.0, %v4012_v47  ;;  %v4010_v1 = vsub.f32 1.0, %v4006_v6 }
0x1221   : > { %v4021_v54 = vmul.f32 %v4017_v5, %v3917_v10  ;;  %v4015_v14 = vmul.f32 %v4011_v31, %v3931_v0 }
0x1222   : > { %v4020_v8 = vmul.f32 %v4016_v58, %v3916_v15  ;;  %v4014_v25 = vmul.f32 %v4010_v1, %v3930_v44 }
0x1223   : > { %v4019_v48 = vadd.f32 1.0, %v4015_v14 }
0x1224   : > { %4751 = vmatprep.mubr.f32.mxu0 %v4020_v8  ;;  %v4018_v40 = vadd.f32 1.0, %v4014_v25 }
0x1225   : > { %4752 = vmatmul.mubr.f32.vlgmr.msra.gmra.mrb[30].mxu0 %v4021_v54  ;;  %v4023_v4 = vmul.f32 %v4019_v48, %v3919_v26 }
0x1226   : > { %v4022_v59 = vmul.f32 %v4018_v40, %v3918_v3 }
0x1228   : > { %4754 = vmatprep.mubr.f32.mxu0 %v4022_v59 }
0x1229   : > { %4755 = vmatmul.mubr.f32.gmra.mrb[32].mxu0 %v4023_v4 }
0x12f8   : > { %v4753_v42 = vpop.f32.mrb[30].mxu0 }
0x12f9   : > { %v4101_v49 = vadd.f32 %v4753_v42, %v4297_v11  ;;  %v4095_v57 = vpop.f32.mrb[31].mxu0 }
0x12fa   : > { %v4096_v39 = vadd.f32 %v4297_v11, %v4095_v57 }
0x12fb   : > { %v4115_v24 = vadd.f32 %v4101_v49, %v5831_v21 }
0x12fc   : > { %v4114_v62 = vadd.f32 %v4096_v39, %v5833_v61  ;;  %v4756_v17 = vpop.f32.mrb[32].mxu0 }
0x12fd   : > { %4119 = vst.msk [vmem:[%s274_s23 + $0x8] sm:$0xff] %vm287_vm0, %v4115_v24  ;;  %v4111_v63 = vadd.f32 %v4756_v17, %v4297_v11  ;;  %v4105_v41 = vpop.f32.mrb[33].mxu0 }
0x12fe   : > { %4118 = vst.msk [vmem:[%s274_s23] sm:$0xff] %vm287_vm0, %v4114_v62  ;;  %v4106_v2 = vadd.f32 %v4297_v11, %v4105_v41 }
0x12ff   : > { %v4117_v7 = vadd.f32 %v4111_v63, %v5841_v9 }
0x1300   : > { %v4116_v21 = vadd.f32 %v4106_v2, %v5843_v50 }
0x1301   : > { %4121 = vst.msk [vmem:[%s274_s23 + $0x18] sm:$0xff] %vm287_vm0, %v4117_v7 }
0x1302   : > { %4120 = vst.msk [vmem:[%s274_s23 + $0x10] sm:$0xff] %vm287_vm0, %v4116_v21 }
0x1303   : > { %5076 = shalt.err (!%p5073_p3)
}
0x1304   : > { %s5077_s19 = scalar_lea.hbm %s5973_s13, 512  ;;  %s5081_s22 = scalar_lea.hbm %s6028_s7, 1024 }
0x1305   : > { %p5078_p4 = scmp.ne.s32.totalorder %s5973_s13, %s5077_s19  ;;  %p5082_p9 = scmp.lt.u32.totalorder %s5973_s13, %s6028_s7 }
0x1306   : > { %p5083_p10 = scmp.lt.u32.totalorder %s5081_s22, %s5077_s19  ;;  %p5085_p12 = scmp.lt.u32.totalorder %s5077_s19, %s5973_s13 }
0x1307   : > { %p5079_p7 = pnand %p5078_p4, %p5213_p5 }
0x1308   : > { %p5084_p11 = por %p5083_p10, %p5082_p9 }
0x1309   : > { %p5080_p8 = pneg %p5079_p7 }
0x130a   : > { %p5086_p13 = por %p5085_p12, %p5084_p11 }
0x130c   : > { %p5087_p0 = pnand %p5086_p13, %p5080_p8 }
0x130e   : > { %5090 = shalt.err (!%p5087_p0)
}
0x130f   : > { %s5133_s9 = smov 128   ;;  %s5134_s17 = smov 8  }
0x1310   : > { %4885 = dma.vmem_to_hbm [thread:$0]  (%p5213_p5), %s5975_s29, 512, %s5973_s13, %s5980_s28, %s5133_s9, %s5133_s9, %s5134_s17  }
0x1311 PF: > { %p4891_p1 = scmp.ge.s32.totalorder %s5125_s27, 2  ;;  %s4152_s14 = sand.u32 1, %s5113_s24  }
0x1312   : > { %s4153_s15 = scalar_lea.sflag [#allocation3], %s4152_s14 }
0x1313   : > { %p4888_p2 = pnand %p4891_p1, %p5217_p6 }
0x1315   : > { %5108 = dma.done.wait (!%p4888_p2), %s4153_s15, 512  }
0x1316   : > { %5110 = vsyncadd (!%p4888_p2), %s4153_s15, 4294966784  ;;  %p17_p3 = scmp.ge.s32.totalorder %s5200_s30, 4   ;;  %s6037_s24 = smov %s5117_s25 }
0x1317   : > { %s6038_s25 = smov %s5121_s26  ;;  %s6039_s26 = smov %s5211_s10 }
0x1318   : > { %s6040_s27 = smov %s5200_s30  ;;  %19 = sbr.rel (!%p17_p3) target bundleno = 3 (0x3), region = 83 }
0x131f   :  { %4158 = vsyncpa [#allocation3], 1 }
0x1320   :  { %4160 = vsyncpa [#allocation3 + $0x1], 1 }

</bundles_post_ra>
